<compile_context>
chip_gen: v5e
topology: v5e:2x2
jax: 0.10.0
libtpu: 0.0.40
codegen_flags: <defaults>
</compile_context>

<pallas_src>
import functools

import jax
import jax.numpy as jnp
from jax import lax
from jax.experimental import pallas as pl
from jax.experimental.pallas import tpu as pltpu


def _hash_uniform(shape, seed_u32, stream):
    """Counter-based U(0,1) noise: murmur3-style fmix32 of (linear index, seed, stream).

    Uses only plain 32-bit integer ops (multiply / add / xor / constant shifts), which
    lower on the TPU VPU under Mosaic *and* run under Pallas interpret mode — unlike
    pltpu.prng_* which is Mosaic-only.
    """
    E, B, O = shape
    e = lax.broadcasted_iota(jnp.int32, shape, 0)
    b = lax.broadcasted_iota(jnp.int32, shape, 1)
    o = lax.broadcasted_iota(jnp.int32, shape, 2)
    idx = ((e * B + b) * O + o).astype(jnp.uint32)

    h = idx * jnp.uint32(0x9E3779B9)
    h = h + seed_u32 * jnp.uint32(0x85EBCA6B)
    h = h + jnp.uint32(stream)
    # murmur3 finalizer (avalanche).
    h = h ^ (h >> 16)
    h = h * jnp.uint32(0x85EBCA6B)
    h = h ^ (h >> 13)
    h = h * jnp.uint32(0xC2B2AE35)
    h = h ^ (h >> 16)
    # Top 24 bits -> exact float32 integer -> uniform in [0, 1).
    u24 = (h >> 8).astype(jnp.int32).astype(jnp.float32)
    return u24 * jnp.float32(1.0 / 16777216.0)


def _make_alpha_kernel(En, On, Er, Or_, B, gsm_soften_eps, temperature):
    """Single kernel handling both ('normal', 'reduce') alpha families."""
    inv_temp = float(1.0 / float(temperature))
    eps = float(gsm_soften_eps)

    def _soften(alpha):
        # alpha <- log(softmax(alpha) + eps)   (matches the torch module)
        if eps > 0.0:
            m = jnp.max(alpha, axis=-1, keepdims=True)
            ex = jnp.exp(alpha - m)
            q = ex / jnp.sum(ex, axis=-1, keepdims=True)          # exact normalization
            alpha = jnp.log(q + jnp.float32(eps))
        return alpha

    def _family(alpha, seed_u32, stream, E, O, logit_ref, w_ref, dis_ref):
        soft = _soften(alpha)                                      # (E, O)
        logit = jnp.broadcast_to(soft[:, None, :], (E, B, O))      # (E, B, O)
        logit_ref[...] = logit                                     # 'logit_*' output

        # --- gumbel_softmax_sample(logit, temperature) --------------------------
        # TODO(synk): gsm_type variants (e.g. straight-through) are not
        # distinguished; this is the standard soft Gumbel-Softmax sample.
        u = _hash_uniform((E, B, O), seed_u32, stream)
        g = -jnp.log(-jnp.log(u + 1e-20) + 1e-20)                  # Gumbel(0,1)
        y = (logit + g) * jnp.float32(inv_temp)
        ym = jnp.max(y, axis=-1, keepdims=True)
        ey = jnp.exp(y - ym)
        w = ey / jnp.sum(ey, axis=-1, keepdims=True)               # exact softmax
        w_ref[...] = w

        # --- discrete = one_hot(argmax(weights)) --------------------------------
        # argmax(w) == argmax(y): reuse ym instead of recomputing max(w);
        # first-max tie-break mirrors torch.argmax semantics.
        iota = lax.broadcasted_iota(jnp.int32, (E, B, O), 2)
        masked = jnp.where(y >= ym, iota, jnp.int32(O))
        idx = jnp.min(masked, axis=-1, keepdims=True)
        dis_ref[...] = (iota == idx).astype(jnp.float32)

    def kernel(seed_ref, an_ref, ar_ref,
               ln_ref, wn_ref, dn_ref, lr_ref, wr_ref, dr_ref):
        seed_u32 = seed_ref[0].astype(jnp.uint32)
        # Distinct hash "streams" keep normal/reduce noise independent even when
        # the two alpha tensors share the same shape.
        _family(an_ref[...], seed_u32, 0x0000F00D, En, On, ln_ref, wn_ref, dn_ref)
        _family(ar_ref[...], seed_u32, 0x0BADBEEF, Er, Or_, lr_ref, wr_ref, dr_ref)

    return kernel


@functools.partial(jax.jit, static_argnums=(3, 4, 5))
def _alpha_forward(alphas_normal, alphas_reduce, seed_arr, B,
                   gsm_soften_eps, temperature):
    En, On = alphas_normal.shape
    Er, Or_ = alphas_reduce.shape
    kernel = _make_alpha_kernel(En, On, Er, Or_, B, gsm_soften_eps, temperature)

    vmem = pl.BlockSpec(memory_space=pltpu.MemorySpace.VMEM)
    smem = pl.BlockSpec(memory_space=pltpu.MemorySpace.SMEM)
    f32 = jnp.float32

    # Single ungridded pallas_call; whole arrays are the blocks (tiny shapes).
    ln, wn, dn, lr, wr, dr = pl.pallas_call(
        kernel,
        out_shape=(
            jax.ShapeDtypeStruct((En, B, On), f32),   # logit_normal
            jax.ShapeDtypeStruct((En, B, On), f32),   # normal (weights)
            jax.ShapeDtypeStruct((En, B, On), f32),   # dis_normal
            jax.ShapeDtypeStruct((Er, B, Or_), f32),  # logit_reduce
            jax.ShapeDtypeStruct((Er, B, Or_), f32),  # reduce (weights)
            jax.ShapeDtypeStruct((Er, B, Or_), f32),  # dis_reduce
        ),
        in_specs=[smem, vmem, vmem],
        out_specs=(vmem, vmem, vmem, vmem, vmem, vmem),
    )(seed_arr, alphas_normal, alphas_reduce)

    return {
        'normal': wn,
        'reduce': wr,
        'logit_normal': ln,
        'logit_reduce': lr,
        'dis_normal': dn,
        'dis_reduce': dr,
    }


class AlphaPallas:
    """JAX/Pallas port of the ProxylessNAS `Alpha` module forward pass."""

    def __init__(self, num_normal, num_reduce, num_op_normal, num_op_reduce,
                 gsm_soften_eps, gsm_temperature, gsm_type, same_alpha_minibatch):
        self.num_normal = num_normal
        self.num_reduce = num_reduce
        self.num_op_normal = num_op_normal
        self.num_op_reduce = num_op_reduce
        self._gsm_soften_eps = float(gsm_soften_eps)
        self._temperature = float(gsm_temperature)
        self.gsm_type = gsm_type
        self._same_alpha_minibatch = same_alpha_minibatch
        # Deterministic init, matching nn.Parameter(torch.zeros(...)) in the module.
        self.alphas_normal = jnp.zeros((num_normal, num_op_normal), jnp.float32)
        self.alphas_reduce = jnp.zeros((num_reduce, num_op_reduce), jnp.float32)

    def forward(self, batch_size, seed=0):
        # With same_alpha_minibatch=True the torch module does not expand over the
        # minibatch, so outputs carry a size-1 batch dim (B=1) — same here.
        # NOTE: vary `seed` between forward calls to get fresh Gumbel noise.
        B = 1 if self._same_alpha_minibatch else int(batch_size)
        seed_arr = jnp.asarray([seed], dtype=jnp.int32)
        return _alpha_forward(self.alphas_normal, self.alphas_reduce, seed_arr,
                              B, self._gsm_soften_eps, self._temperature)


if __name__ == "__main__":
    import numpy as np

    # Small deterministic setup; different op counts exercise the single-launch
    # path for heterogeneous normal/reduce shapes.
    num_normal, num_reduce = 8, 6
    num_op_normal, num_op_reduce = 8, 7
    batch_size = 2
    gsm_soften_eps = 0.1

    model = AlphaPallas(
        num_normal=num_normal,
        num_reduce=num_reduce,
        num_op_normal=num_op_normal,
        num_op_reduce=num_op_reduce,
        gsm_soften_eps=gsm_soften_eps,
        gsm_temperature=1.0,
        gsm_type='original',
        same_alpha_minibatch=False,
    )

    # The module initializes alphas to zeros; perturb them deterministically for a
    # more meaningful numerical check.
    kn, kr = jax.random.split(jax.random.PRNGKey(0))
    model.alphas_normal = 0.5 * jax.random.normal(kn, (num_normal, num_op_normal), jnp.float32)
    model.alphas_reduce = 0.5 * jax.random.normal(kr, (num_reduce, num_op_reduce), jnp.float32)

    out = model.forward(batch_size, seed=0)
    out = jax.tree_util.tree_map(jax.block_until_ready, out)

    for name, alpha, E, O in (
            ('normal', model.alphas_normal, num_normal, num_op_normal),
            ('reduce', model.alphas_reduce, num_reduce, num_op_reduce)):
        w = np.asarray(out[name])
        d = np.asarray(out['dis_' + name])
        l = np.asarray(out['logit_' + name])
        assert w.shape == (E, batch_size, O)
        assert d.shape == (E, batch_size, O)
        assert l.shape == (E, batch_size, O)

        # logit == broadcast(log(softmax(alpha) + eps)).
        ref = np.log(np.asarray(jax.nn.softmax(alpha, axis=-1)) + gsm_soften_eps)
        assert np.allclose(l, np.broadcast_to(ref[:, None, :], l.shape), atol=1e-4)

        # Gumbel-softmax weights: rows sum to 1 (exact normalization in-kernel).
        assert np.allclose(w.sum(-1), 1.0, atol=1e-5)

        # Discrete samples: binary one-hot rows placed at a maximal weight.
        assert np.allclose(d.sum(-1), 1.0)
        assert set(np.unique(d)) <= {0.0, 1.0}
        assert np.allclose((w * d).sum(-1), w.max(-1), atol=1e-6)

    print("KERNEL_OK")
</pallas_src>

<mosaic_0001>
module attributes {stable_mosaic.version = 11 : i64} {
  func.func @kernel(%arg0: memref<1xi32, #tpu.memory_space<smem>>, %arg1: memref<8x8xf32, #tpu.memory_space<vmem>>, %arg2: memref<6x7xf32, #tpu.memory_space<vmem>>, %arg3: memref<8x2x8xf32, #tpu.memory_space<vmem>>, %arg4: memref<8x2x8xf32, #tpu.memory_space<vmem>>, %arg5: memref<8x2x8xf32, #tpu.memory_space<vmem>>, %arg6: memref<6x2x7xf32, #tpu.memory_space<vmem>>, %arg7: memref<6x2x7xf32, #tpu.memory_space<vmem>>, %arg8: memref<6x2x7xf32, #tpu.memory_space<vmem>>) attributes {dimension_semantics = [], scalar_prefetch = 0 : i64, scratch_operands = 0 : i64, tpu.core_type = #tpu.core_type<tc>} {
    %c0 = arith.constant 0 : index
    %0 = memref.load %arg0[%c0] : memref<1xi32, #tpu.memory_space<smem>>
    %c0_0 = arith.constant 0 : index
    %c0_1 = arith.constant 0 : index
    %1 = vector.load %arg1[%c0_0, %c0_1] : memref<8x8xf32, #tpu.memory_space<vmem>>, vector<8x8xf32>
    %cst = arith.constant dense<0xFF800000> : vector<8xf32>
    %2 = vector.multi_reduction <maximumf>, %1, %cst [1] : vector<8x8xf32> to vector<8xf32>
    %3 = vector.shape_cast %2 : vector<8xf32> to vector<8x1xf32>
    %4 = vector.broadcast %3 : vector<8x1xf32> to vector<8x8xf32>
    %5 = arith.subf %1, %4 : vector<8x8xf32>
    %6 = math.exp %5 : vector<8x8xf32>
    %cst_2 = arith.constant dense<0.000000e+00> : vector<8xf32>
    %7 = vector.multi_reduction <add>, %6, %cst_2 [1] : vector<8x8xf32> to vector<8xf32>
    %8 = vector.shape_cast %7 : vector<8xf32> to vector<8x1xf32>
    %9 = vector.broadcast %8 : vector<8x1xf32> to vector<8x8xf32>
    %10 = arith.divf %6, %9 : vector<8x8xf32>
    %cst_3 = arith.constant 1.000000e-01 : f32
    %11 = vector.broadcast %cst_3 : f32 to vector<8x8xf32>
    %12 = arith.addf %10, %11 : vector<8x8xf32>
    %13 = math.log %12 : vector<8x8xf32>
    %14 = vector.shape_cast %13 : vector<8x8xf32> to vector<8x1x8xf32>
    %15 = vector.shape_cast %14 : vector<8x1x8xf32> to vector<8x1x8xf32>
    %16 = vector.broadcast %15 : vector<8x1x8xf32> to vector<8x2x8xf32>
    %c0_4 = arith.constant 0 : index
    %c0_5 = arith.constant 0 : index
    %c0_6 = arith.constant 0 : index
    %17 = vector.load %arg3[%c0_4, %c0_5, %c0_6] : memref<8x2x8xf32, #tpu.memory_space<vmem>>, vector<8x2x8xf32>
    tpu.vector_store %arg3[%c0_4, %c0_5, %c0_6], %16 {strides = array<i32>} : memref<8x2x8xf32, #tpu.memory_space<vmem>>, vector<8x2x8xf32>,
    %18 = tpu.iota {dimensions = array<i32: 0>} : vector<8x2x8xi32>
    %19 = tpu.iota {dimensions = array<i32: 1>} : vector<8x2x8xi32>
    %20 = tpu.iota {dimensions = array<i32: 2>} : vector<8x2x8xi32>
    %c2_i32 = arith.constant 2 : i32
    %21 = vector.broadcast %c2_i32 : i32 to vector<8x2x8xi32>
    %22 = arith.muli %18, %21 : vector<8x2x8xi32>
    %23 = arith.addi %22, %19 : vector<8x2x8xi32>
    %c8_i32 = arith.constant 8 : i32
    %24 = vector.broadcast %c8_i32 : i32 to vector<8x2x8xi32>
    %25 = arith.muli %23, %24 : vector<8x2x8xi32>
    %26 = arith.addi %25, %20 : vector<8x2x8xi32>
    %c-1640531527_i32 = arith.constant -1640531527 : i32
    %27 = vector.broadcast %c-1640531527_i32 : i32 to vector<8x2x8xi32>
    %28 = arith.muli %26, %27 : vector<8x2x8xi32>
    %c-2048144789_i32 = arith.constant -2048144789 : i32
    %29 = arith.muli %0, %c-2048144789_i32 : i32
    %30 = vector.broadcast %29 : i32 to vector<8x2x8xi32>
    %31 = arith.addi %28, %30 : vector<8x2x8xi32>
    %c61453_i32 = arith.constant 61453 : i32
    %32 = vector.broadcast %c61453_i32 : i32 to vector<8x2x8xi32>
    %33 = arith.addi %31, %32 : vector<8x2x8xi32>
    %c16_i32 = arith.constant 16 : i32
    %34 = vector.broadcast %c16_i32 : i32 to vector<8x2x8xi32>
    %35 = arith.shrui %33, %34 : vector<8x2x8xi32>
    %36 = arith.xori %33, %35 : vector<8x2x8xi32>
    %c-2048144789_i32_7 = arith.constant -2048144789 : i32
    %37 = vector.broadcast %c-2048144789_i32_7 : i32 to vector<8x2x8xi32>
    %38 = arith.muli %36, %37 : vector<8x2x8xi32>
    %c13_i32 = arith.constant 13 : i32
    %39 = vector.broadcast %c13_i32 : i32 to vector<8x2x8xi32>
    %40 = arith.shrui %38, %39 : vector<8x2x8xi32>
    %41 = arith.xori %38, %40 : vector<8x2x8xi32>
    %c-1028477387_i32 = arith.constant -1028477387 : i32
    %42 = vector.broadcast %c-1028477387_i32 : i32 to vector<8x2x8xi32>
    %43 = arith.muli %41, %42 : vector<8x2x8xi32>
    %c16_i32_8 = arith.constant 16 : i32
    %44 = vector.broadcast %c16_i32_8 : i32 to vector<8x2x8xi32>
    %45 = arith.shrui %43, %44 : vector<8x2x8xi32>
    %46 = arith.xori %43, %45 : vector<8x2x8xi32>
    %c8_i32_9 = arith.constant 8 : i32
    %47 = vector.broadcast %c8_i32_9 : i32 to vector<8x2x8xi32>
    %48 = arith.shrui %46, %47 : vector<8x2x8xi32>
    %49 = arith.sitofp %48 : vector<8x2x8xi32> to vector<8x2x8xf32>
    %cst_10 = arith.constant 5.96046448E-8 : f32
    %50 = vector.broadcast %cst_10 : f32 to vector<8x2x8xf32>
    %51 = arith.mulf %49, %50 : vector<8x2x8xf32>
    %cst_11 = arith.constant 9.99999968E-21 : f32
    %52 = vector.broadcast %cst_11 : f32 to vector<8x2x8xf32>
    %53 = arith.addf %51, %52 : vector<8x2x8xf32>
    %54 = math.log %53 : vector<8x2x8xf32>
    %cst_12 = arith.constant 0.000000e+00 : f32
    %55 = vector.broadcast %cst_12 : f32 to vector<8x2x8xf32>
    %56 = arith.subf %55, %54 : vector<8x2x8xf32>
    %cst_13 = arith.constant 9.99999968E-21 : f32
    %57 = vector.broadcast %cst_13 : f32 to vector<8x2x8xf32>
    %58 = arith.addf %56, %57 : vector<8x2x8xf32>
    %59 = math.log %58 : vector<8x2x8xf32>
    %cst_14 = arith.constant 0.000000e+00 : f32
    %60 = vector.broadcast %cst_14 : f32 to vector<8x2x8xf32>
    %61 = arith.subf %60, %59 : vector<8x2x8xf32>
    %62 = arith.addf %16, %61 : vector<8x2x8xf32>
    %cst_15 = arith.constant 1.000000e+00 : f32
    %63 = vector.broadcast %cst_15 : f32 to vector<8x2x8xf32>
    %64 = arith.mulf %62, %63 : vector<8x2x8xf32>
    %cst_16 = arith.constant dense<0xFF800000> : vector<8x2xf32>
    %65 = vector.multi_reduction <maximumf>, %64, %cst_16 [2] : vector<8x2x8xf32> to vector<8x2xf32>
    %66 = vector.shape_cast %65 : vector<8x2xf32> to vector<8x2x1xf32>
    %67 = vector.broadcast %66 : vector<8x2x1xf32> to vector<8x2x8xf32>
    %68 = arith.subf %64, %67 : vector<8x2x8xf32>
    %69 = math.exp %68 : vector<8x2x8xf32>
    %cst_17 = arith.constant dense<0.000000e+00> : vector<8x2xf32>
    %70 = vector.multi_reduction <add>, %69, %cst_17 [2] : vector<8x2x8xf32> to vector<8x2xf32>
    %71 = vector.shape_cast %70 : vector<8x2xf32> to vector<8x2x1xf32>
    %72 = vector.broadcast %71 : vector<8x2x1xf32> to vector<8x2x8xf32>
    %73 = arith.divf %69, %72 : vector<8x2x8xf32>
    %c0_18 = arith.constant 0 : index
    %c0_19 = arith.constant 0 : index
    %c0_20 = arith.constant 0 : index
    %74 = vector.load %arg4[%c0_18, %c0_19, %c0_20] : memref<8x2x8xf32, #tpu.memory_space<vmem>>, vector<8x2x8xf32>
    tpu.vector_store %arg4[%c0_18, %c0_19, %c0_20], %73 {strides = array<i32>} : memref<8x2x8xf32, #tpu.memory_space<vmem>>, vector<8x2x8xf32>,
    %75 = tpu.iota {dimensions = array<i32: 2>} : vector<8x2x8xi32>
    %76 = vector.broadcast %66 : vector<8x2x1xf32> to vector<8x2x8xf32>
    %77 = arith.cmpf oge, %64, %76 : vector<8x2x8xf32>
    %c8_i32_21 = arith.constant 8 : i32
    %78 = vector.broadcast %c8_i32_21 : i32 to vector<8x2x8xi32>
    %79 = arith.select %77, %75, %78 : vector<8x2x8xi1>, vector<8x2x8xi32>
    %cst_22 = arith.constant dense<2147483647> : vector<8x2xi32>
    %80 = vector.multi_reduction <minsi>, %79, %cst_22 [2] : vector<8x2x8xi32> to vector<8x2xi32>
    %81 = vector.shape_cast %80 : vector<8x2xi32> to vector<8x2x1xi32>
    %82 = vector.broadcast %81 : vector<8x2x1xi32> to vector<8x2x8xi32>
    %83 = arith.cmpi eq, %75, %82 : vector<8x2x8xi32>
    %84 = arith.extui %83 : vector<8x2x8xi1> to vector<8x2x8xi32>
    %85 = arith.sitofp %84 : vector<8x2x8xi32> to vector<8x2x8xf32>
    %c0_23 = arith.constant 0 : index
    %c0_24 = arith.constant 0 : index
    %c0_25 = arith.constant 0 : index
    %86 = vector.load %arg5[%c0_23, %c0_24, %c0_25] : memref<8x2x8xf32, #tpu.memory_space<vmem>>, vector<8x2x8xf32>
    tpu.vector_store %arg5[%c0_23, %c0_24, %c0_25], %85 {strides = array<i32>} : memref<8x2x8xf32, #tpu.memory_space<vmem>>, vector<8x2x8xf32>,
    %c0_26 = arith.constant 0 : index
    %c0_27 = arith.constant 0 : index
    %87 = vector.load %arg2[%c0_26, %c0_27] : memref<6x7xf32, #tpu.memory_space<vmem>>, vector<6x7xf32>
    %cst_28 = arith.constant dense<0xFF800000> : vector<6xf32>
    %88 = vector.multi_reduction <maximumf>, %87, %cst_28 [1] : vector<6x7xf32> to vector<6xf32>
    %89 = vector.shape_cast %88 : vector<6xf32> to vector<6x1xf32>
    %90 = vector.broadcast %89 : vector<6x1xf32> to vector<6x7xf32>
    %91 = arith.subf %87, %90 : vector<6x7xf32>
    %92 = math.exp %91 : vector<6x7xf32>
    %cst_29 = arith.constant dense<0.000000e+00> : vector<6xf32>
    %93 = vector.multi_reduction <add>, %92, %cst_29 [1] : vector<6x7xf32> to vector<6xf32>
    %94 = vector.shape_cast %93 : vector<6xf32> to vector<6x1xf32>
    %95 = vector.broadcast %94 : vector<6x1xf32> to vector<6x7xf32>
    %96 = arith.divf %92, %95 : vector<6x7xf32>
    %cst_30 = arith.constant 1.000000e-01 : f32
    %97 = vector.broadcast %cst_30 : f32 to vector<6x7xf32>
    %98 = arith.addf %96, %97 : vector<6x7xf32>
    %99 = math.log %98 : vector<6x7xf32>
    %100 = vector.shape_cast %99 : vector<6x7xf32> to vector<6x1x7xf32>
    %101 = vector.shape_cast %100 : vector<6x1x7xf32> to vector<6x1x7xf32>
    %102 = vector.broadcast %101 : vector<6x1x7xf32> to vector<6x2x7xf32>
    %c0_31 = arith.constant 0 : index
    %c0_32 = arith.constant 0 : index
    %c0_33 = arith.constant 0 : index
    %103 = vector.load %arg6[%c0_31, %c0_32, %c0_33] : memref<6x2x7xf32, #tpu.memory_space<vmem>>, vector<6x2x7xf32>
    tpu.vector_store %arg6[%c0_31, %c0_32, %c0_33], %102 {strides = array<i32>} : memref<6x2x7xf32, #tpu.memory_space<vmem>>, vector<6x2x7xf32>,
    %104 = tpu.iota {dimensions = array<i32: 0>} : vector<6x2x7xi32>
    %105 = tpu.iota {dimensions = array<i32: 1>} : vector<6x2x7xi32>
    %106 = tpu.iota {dimensions = array<i32: 2>} : vector<6x2x7xi32>
    %c2_i32_34 = arith.constant 2 : i32
    %107 = vector.broadcast %c2_i32_34 : i32 to vector<6x2x7xi32>
    %108 = arith.muli %104, %107 : vector<6x2x7xi32>
    %109 = arith.addi %108, %105 : vector<6x2x7xi32>
    %c7_i32 = arith.constant 7 : i32
    %110 = vector.broadcast %c7_i32 : i32 to vector<6x2x7xi32>
    %111 = arith.muli %109, %110 : vector<6x2x7xi32>
    %112 = arith.addi %111, %106 : vector<6x2x7xi32>
    %c-1640531527_i32_35 = arith.constant -1640531527 : i32
    %113 = vector.broadcast %c-1640531527_i32_35 : i32 to vector<6x2x7xi32>
    %114 = arith.muli %112, %113 : vector<6x2x7xi32>
    %c-2048144789_i32_36 = arith.constant -2048144789 : i32
    %115 = arith.muli %0, %c-2048144789_i32_36 : i32
    %116 = vector.broadcast %115 : i32 to vector<6x2x7xi32>
    %117 = arith.addi %114, %116 : vector<6x2x7xi32>
    %c195935983_i32 = arith.constant 195935983 : i32
    %118 = vector.broadcast %c195935983_i32 : i32 to vector<6x2x7xi32>
    %119 = arith.addi %117, %118 : vector<6x2x7xi32>
    %c16_i32_37 = arith.constant 16 : i32
    %120 = vector.broadcast %c16_i32_37 : i32 to vector<6x2x7xi32>
    %121 = arith.shrui %119, %120 : vector<6x2x7xi32>
    %122 = arith.xori %119, %121 : vector<6x2x7xi32>
    %c-2048144789_i32_38 = arith.constant -2048144789 : i32
    %123 = vector.broadcast %c-2048144789_i32_38 : i32 to vector<6x2x7xi32>
    %124 = arith.muli %122, %123 : vector<6x2x7xi32>
    %c13_i32_39 = arith.constant 13 : i32
    %125 = vector.broadcast %c13_i32_39 : i32 to vector<6x2x7xi32>
    %126 = arith.shrui %124, %125 : vector<6x2x7xi32>
    %127 = arith.xori %124, %126 : vector<6x2x7xi32>
    %c-1028477387_i32_40 = arith.constant -1028477387 : i32
    %128 = vector.broadcast %c-1028477387_i32_40 : i32 to vector<6x2x7xi32>
    %129 = arith.muli %127, %128 : vector<6x2x7xi32>
    %c16_i32_41 = arith.constant 16 : i32
    %130 = vector.broadcast %c16_i32_41 : i32 to vector<6x2x7xi32>
    %131 = arith.shrui %129, %130 : vector<6x2x7xi32>
    %132 = arith.xori %129, %131 : vector<6x2x7xi32>
    %c8_i32_42 = arith.constant 8 : i32
    %133 = vector.broadcast %c8_i32_42 : i32 to vector<6x2x7xi32>
    %134 = arith.shrui %132, %133 : vector<6x2x7xi32>
    %135 = arith.sitofp %134 : vector<6x2x7xi32> to vector<6x2x7xf32>
    %cst_43 = arith.constant 5.96046448E-8 : f32
    %136 = vector.broadcast %cst_43 : f32 to vector<6x2x7xf32>
    %137 = arith.mulf %135, %136 : vector<6x2x7xf32>
    %cst_44 = arith.constant 9.99999968E-21 : f32
    %138 = vector.broadcast %cst_44 : f32 to vector<6x2x7xf32>
    %139 = arith.addf %137, %138 : vector<6x2x7xf32>
    %140 = math.log %139 : vector<6x2x7xf32>
    %cst_45 = arith.constant 0.000000e+00 : f32
    %141 = vector.broadcast %cst_45 : f32 to vector<6x2x7xf32>
    %142 = arith.subf %141, %140 : vector<6x2x7xf32>
    %cst_46 = arith.constant 9.99999968E-21 : f32
    %143 = vector.broadcast %cst_46 : f32 to vector<6x2x7xf32>
    %144 = arith.addf %142, %143 : vector<6x2x7xf32>
    %145 = math.log %144 : vector<6x2x7xf32>
    %cst_47 = arith.constant 0.000000e+00 : f32
    %146 = vector.broadcast %cst_47 : f32 to vector<6x2x7xf32>
    %147 = arith.subf %146, %145 : vector<6x2x7xf32>
    %148 = arith.addf %102, %147 : vector<6x2x7xf32>
    %cst_48 = arith.constant 1.000000e+00 : f32
    %149 = vector.broadcast %cst_48 : f32 to vector<6x2x7xf32>
    %150 = arith.mulf %148, %149 : vector<6x2x7xf32>
    %cst_49 = arith.constant dense<0xFF800000> : vector<6x2xf32>
    %151 = vector.multi_reduction <maximumf>, %150, %cst_49 [2] : vector<6x2x7xf32> to vector<6x2xf32>
    %152 = vector.shape_cast %151 : vector<6x2xf32> to vector<6x2x1xf32>
    %153 = vector.broadcast %152 : vector<6x2x1xf32> to vector<6x2x7xf32>
    %154 = arith.subf %150, %153 : vector<6x2x7xf32>
    %155 = math.exp %154 : vector<6x2x7xf32>
    %cst_50 = arith.constant dense<0.000000e+00> : vector<6x2xf32>
    %156 = vector.multi_reduction <add>, %155, %cst_50 [2] : vector<6x2x7xf32> to vector<6x2xf32>
    %157 = vector.shape_cast %156 : vector<6x2xf32> to vector<6x2x1xf32>
    %158 = vector.broadcast %157 : vector<6x2x1xf32> to vector<6x2x7xf32>
    %159 = arith.divf %155, %158 : vector<6x2x7xf32>
    %c0_51 = arith.constant 0 : index
    %c0_52 = arith.constant 0 : index
    %c0_53 = arith.constant 0 : index
    %160 = vector.load %arg7[%c0_51, %c0_52, %c0_53] : memref<6x2x7xf32, #tpu.memory_space<vmem>>, vector<6x2x7xf32>
    tpu.vector_store %arg7[%c0_51, %c0_52, %c0_53], %159 {strides = array<i32>} : memref<6x2x7xf32, #tpu.memory_space<vmem>>, vector<6x2x7xf32>,
    %161 = tpu.iota {dimensions = array<i32: 2>} : vector<6x2x7xi32>
    %162 = vector.broadcast %152 : vector<6x2x1xf32> to vector<6x2x7xf32>
    %163 = arith.cmpf oge, %150, %162 : vector<6x2x7xf32>
    %c7_i32_54 = arith.constant 7 : i32
    %164 = vector.broadcast %c7_i32_54 : i32 to vector<6x2x7xi32>
    %165 = arith.select %163, %161, %164 : vector<6x2x7xi1>, vector<6x2x7xi32>
    %cst_55 = arith.constant dense<2147483647> : vector<6x2xi32>
    %166 = vector.multi_reduction <minsi>, %165, %cst_55 [2] : vector<6x2x7xi32> to vector<6x2xi32>
    %167 = vector.shape_cast %166 : vector<6x2xi32> to vector<6x2x1xi32>
    %168 = vector.broadcast %167 : vector<6x2x1xi32> to vector<6x2x7xi32>
    %169 = arith.cmpi eq, %161, %168 : vector<6x2x7xi32>
    %170 = arith.extui %169 : vector<6x2x7xi1> to vector<6x2x7xi32>
    %171 = arith.sitofp %170 : vector<6x2x7xi32> to vector<6x2x7xf32>
    %c0_56 = arith.constant 0 : index
    %c0_57 = arith.constant 0 : index
    %c0_58 = arith.constant 0 : index
    %172 = vector.load %arg8[%c0_56, %c0_57, %c0_58] : memref<6x2x7xf32, #tpu.memory_space<vmem>>, vector<6x2x7xf32>
    tpu.vector_store %arg8[%c0_56, %c0_57, %c0_58], %171 {strides = array<i32>} : memref<6x2x7xf32, #tpu.memory_space<vmem>>, vector<6x2x7xf32>,
    return
  }
}

</mosaic_0001>

<bundles_post_ra>
// kernel: _alpha_forward.1
= control target key start
LH: loop header
LB: loop body
LE: loop exit
PB: predicated region body
PF: predicated region fallthrough
CT: control target
= control target key end

     0   :  { %15 = vsyncpa [#allocation4], 0  ;;  %s2536_s0 = inlined_call_operand.<no memory space> [shape: s32[1], index: 0, kind: input, shape index: {}]   ;;  %s2537_s1 = inlined_call_operand.hbm [shape: f32[8,8], index: 1, kind: input, shape index: {}]   ;;  %s2538_s2 = inlined_call_operand.hbm [shape: f32[6,7], index: 2, kind: input, shape index: {}]   ;;  %s2539_s3 = inlined_call_operand.hbm [shape: f32[8,2,8], index: 3, kind: output, shape index: {0}]   ;;  %s2540_s4 = inlined_call_operand.hbm [shape: f32[8,2,8], index: 4, kind: output, shape index: {1}]   ;;  %s2541_s5 = inlined_call_operand.hbm [shape: f32[8,2,8], index: 5, kind: output, shape index: {2}]   ;;  %s2542_s6 = inlined_call_operand.hbm [shape: f32[6,2,7], index: 6, kind: output, shape index: {3}]   ;;  %s2543_s7 = inlined_call_operand.hbm [shape: f32[6,2,7], index: 7, kind: output, shape index: {4}]   ;;  %s2544_s8 = inlined_call_operand.hbm [shape: f32[6,2,7], index: 8, kind: output, shape index: {5}]  }
   0x1   :  { %16 = vsyncpa [#allocation7], 0 }
   0x2   :  { %17 = vsyncpa [#allocation5], 0 }
   0x3   :  { %18 = vsyncpa [#allocation10], 0 }
   0x4   :  { %19 = vsyncpa [#allocation13], 0 }
   0x5   :  { %20 = vsyncpa [#allocation16], 0  ;;  %s28_s29 = sshll.u32 %s2537_s1, 4  ;;  %s1638_s30 = smov [#allocation3]   ;;  %s29_s29 = int_to_ptr.hbm [resolvable:$true] %s28_s29 }
   0x6   :  { %s30_s9 = sshll.u32 %s1638_s30, 4  ;;  %s39_s12 = sshll.u32 %s2538_s2, 4  ;;  %s31_s9 = int_to_ptr.vmem [resolvable:$true] %s30_s9  ;;  %s40_s12 = int_to_ptr.hbm [resolvable:$true] %s39_s12 }
   0x7   :  { %33 = dma.hbm_to_vmem [thread:$0]  %s29_s29, 128, %s31_s9, [#allocation4]  }
   0x8   :  { %s1639_s13 = smov [#allocation6]  }
   0x9   :  { %s41_s14 = sshll.u32 %s1639_s13, 4  ;;  %s42_s14 = int_to_ptr.vmem [resolvable:$true] %s41_s14 }
   0xa   :  { %44 = dma.hbm_to_vmem [thread:$0]  %s40_s12, 128, %s42_s14, [#allocation7]  }
   0xb   :  { %1626 = dma.done.wait [#allocation4], 128  }
   0xc   :  { %1627 = vsyncadd [#allocation4], 4294967168 }
   0xd   :  { %1628 = dma.done.wait [#allocation7], 128  }
   0xe   :  { %1629 = vsyncadd [#allocation7], 4294967168  ;;  %vm55_vm0 = vcmask 64512   ;;  %v54_v0 = vld [vmem:[#allocation3] sm:$0xff]  ;;  %v697_v2 = vld [vmem:[#allocation6] sm:$0x3f]  ;;  %v116_v14 = vlaneseq }
   0xf   :  { %v56_v1 = vsel %vm55_vm0, %v54_v0, -inf  ;;  %vm698_vm1 = vcmask 54272   ;;  %s151_s15 = smul.u32 2246822507, %s2536_s0  ;;  %vm107_vm10 = vcmask 58368   ;;  %vm744_vm11 = vcmask 50176  }
  0x10   :  { %57 = vmax.xlane.f32.xlu0 %v56_v1  ;;  %v699_v3 = vsel %vm698_vm1, %v697_v2, -inf  ;;  %v117_v15 = vshrl.u32 %v116_v14, 7  ;;  %v1708_v16 = vand.u32 127, %v116_v14  ;;  %s1640_s0 = smov [#allocation12]   ;;  %s1222_s19 = sshll.u32 %s2542_s6, 4  ;;  %s1223_s19 = int_to_ptr.hbm [resolvable:$true] %s1222_s19 }
  0x11   :  { %v1724_v29 = vstv %s151_s15  ;;  %s1220_s16 = sshll.u32 %s1640_s0, 4  ;;  %s1641_s20 = smov 32   ;;  %s1221_s16 = int_to_ptr.vmem [resolvable:$true] %s1220_s16 }
  0x12   :  { %v127_v17 = vmul.u32 8, %v117_v15  ;;  %v1710_v18 = vadd.s32 6, %v117_v15  ;;  %v1712_v19 = vadd.s32 2, %v117_v15  ;;  %v125_v23 = vadd.s32 12, %v117_v15  ;;  %s1642_s21 = smov 2   ;;  %s1183_s23 = sshll.u32 %s2539_s3, 4  ;;  %s1184_s23 = int_to_ptr.hbm [resolvable:$true] %s1183_s23 }
  0x13   :  { %v1720_v24 = vadd.s32 8, %v117_v15  ;;  %v1727_v31 = vadd.s32 4, %v117_v15  ;;  %v126_v32 = vadd.s32 14, %v117_v15  ;;  %v1733_v40 = vadd.s32 10, %v117_v15  ;;  %s1643_s24 = smov [#allocation8]   ;;  %s1644_s3 = smov [#allocation9]  }
  0x14   :  { %v135_v20 = vadd.s32 %v127_v17, %v1708_v16  ;;  %v130_v21 = vmul.u32 8, %v1710_v18  ;;  %v128_v22 = vmul.u32 8, %v1712_v19  ;;  %v133_v28 = vmul.u32 8, %v125_v23  ;;  %s1181_s25 = sshll.u32 %s1643_s24, 4  ;;  %s2390_s26 = sshll.u32 %s1644_s3, 4  ;;  %s1182_s25 = int_to_ptr.vmem [resolvable:$true] %s1181_s25  ;;  %s1195_s26 = int_to_ptr.vmem [resolvable:$true] %s2390_s26 }
  0x15   :  { %v131_v30 = vmul.u32 8, %v1720_v24  ;;  %v129_v38 = vmul.u32 8, %v1727_v31  ;;  %v134_v39 = vmul.u32 8, %v126_v32  ;;  %v751_v45 = vmul.u32 7, %v117_v15  ;;  %s1196_s29 = sshll.u32 %s2540_s4, 4  ;;  %s1645_s4 = smov [#allocation14]   ;;  %s1197_s29 = int_to_ptr.hbm [resolvable:$true] %s1196_s29 }
  0x16   :  { %v143_v25 = vmul.u32 2654435769, %v135_v20  ;;  %v138_v26 = vadd.s32 %v130_v21, %v1708_v16  ;;  %v136_v27 = vadd.s32 %v128_v22, %v1708_v16  ;;  %v141_v36 = vadd.s32 %v133_v28, %v1708_v16  ;;  %s1233_s30 = sshll.u32 %s1645_s4, 4  ;;  %s1235_s11 = sshll.u32 %s2543_s7, 4  ;;  %s1234_s30 = int_to_ptr.vmem [resolvable:$true] %s1233_s30  ;;  %s1236_s11 = int_to_ptr.hbm [resolvable:$true] %s1235_s11 }
  0x17   :  { %v139_v37 = vadd.s32 %v131_v30, %v1708_v16  ;;  %v137_v47 = vadd.s32 %v129_v38, %v1708_v16  ;;  %v142_v48 = vadd.s32 %v134_v39, %v1708_v16  ;;  %v757_v53 = vadd.s32 %v751_v45, %v1708_v16  ;;  %s1647_s7 = smov [#allocation11]   ;;  %s1209_s1 = sshll.u32 %s2541_s5, 4  ;;  %s1210_s1 = int_to_ptr.hbm [resolvable:$true] %s1209_s1 }
  0x18   :  { %700 = vmax.xlane.f32.xlu0 %v699_v3  ;;  %v153_v33 = vadd.s32 %v1724_v29, %v143_v25  ;;  %v146_v34 = vmul.u32 2654435769, %v138_v26  ;;  %v144_v35 = vmul.u32 2654435769, %v136_v27  ;;  %v149_v44 = vmul.u32 2654435769, %v141_v36 }
  0x19   :  { %v147_v46 = vmul.u32 2654435769, %v139_v37  ;;  %v145_v55 = vmul.u32 2654435769, %v137_v47  ;;  %v150_v56 = vmul.u32 2654435769, %v142_v48 }
  0x1a   :  { %v161_v41 = vadd.s32 61453, %v153_v33  ;;  %v156_v42 = vadd.s32 %v1724_v29, %v146_v34  ;;  %v154_v43 = vadd.s32 %v1724_v29, %v144_v35  ;;  %v159_v52 = vadd.s32 %v1724_v29, %v149_v44  ;;  %s1207_s12 = sshll.u32 %s1647_s7, 4  ;;  %s1648_s5 = smov [#allocation15]   ;;  %s1208_s12 = int_to_ptr.vmem [resolvable:$true] %s1207_s12 }
  0x1b   :  { %v157_v54 = vadd.s32 %v1724_v29, %v147_v46  ;;  %v763_v61 = vmul.u32 2654435769, %v757_v53  ;;  %v155_v63 = vadd.s32 %v1724_v29, %v145_v55  ;;  %s1246_s2 = sshll.u32 %s1648_s5, 4  ;;  %s1247_s2 = int_to_ptr.vmem [resolvable:$true] %s1246_s2 }
  0x1c   :  { %v169_v49 = vshrl.u32 %v161_v41, 16  ;;  %v164_v50 = vadd.s32 61453, %v156_v42  ;;  %v162_v51 = vadd.s32 61453, %v154_v43  ;;  %v167_v60 = vadd.s32 61453, %v159_v52 }
  0x1d   :  { %v165_v62 = vadd.s32 61453, %v157_v54 }
  0x1e   :  { %v177_v57 = vxor.u32 %v169_v49, %v161_v41  ;;  %v172_v58 = vshrl.u32 %v164_v50, 16  ;;  %v170_v59 = vshrl.u32 %v162_v51, 16 }
  0x20   :  { %v185_v1 = vmul.u32 2246822507, %v177_v57  ;;  %v178_v3 = vxor.u32 %v170_v59, %v162_v51 }
  0x83   :  { %v58_v4 = vpop.xlane.xlu0 %57 }
  0x84   :  { %v59_v5 = vsub.f32 %v54_v0, %v58_v4  ;;  %v1744_v0 = vadd.s32 %v1724_v29, %v150_v56  ;;  %v175_v4 = vshrl.u32 %v167_v60, 16 }
  0x86   :  { %v60_v6 = vmul.f32 1.442695, %v59_v5  ;;  %v769_v5 = vadd.s32 %v763_v61, %v1724_v29  ;;  %v183_v14 = vxor.u32 %v175_v4, %v167_v60 }
  0x88   :  { %1310 = vpow2.f32 %v60_v6  ;;  %v173_v6 = vshrl.u32 %v165_v62, 16  ;;  %v775_v15 = vadd.s32 195935983, %v769_v5  ;;  %v191_v26 = vmul.u32 2246822507, %v183_v14 }
  0x8a   :  { %v181_v17 = vxor.u32 %v173_v6, %v165_v62  ;;  %v781_v27 = vshrl.u32 %v775_v15, 16  ;;  %v199_v35 = vshrl.u32 %v191_v26, 13 }
  0x8b   :  { %v701_v7 = vpop.xlane.xlu0 %700 }
  0x8c   :  { %v702_v8 = vsub.f32 %v697_v2, %v701_v7  ;;  %v180_v2 = vxor.u32 %v172_v58, %v164_v50  ;;  %v163_v7 = vadd.s32 61453, %v155_v63  ;;  %v189_v28 = vmul.u32 2246822507, %v181_v17 }
  0x8d   :  { %v787_v36 = vxor.u32 %v781_v27, %v775_v15  ;;  %v207_v44 = vxor.u32 %v199_v35, %v191_v26 }
  0x8e   :  { %v1701_v9 = vpop.eup %1310  ;;  %v703_v10 = vmul.f32 1.442695, %v702_v8  ;;  %v752_v8 = vmul.u32 7, %v1712_v19  ;;  %v171_v20 = vshrl.u32 %v163_v7, 16  ;;  %v197_v37 = vshrl.u32 %v189_v28, 13 }
  0x8f   :  { %v62_v11 = vsel %vm55_vm0, %v1701_v9, 0.0  ;;  %v793_v45 = vmul.u32 2246822507, %v787_v36  ;;  %v215_v52 = vmul.u32 3266489909, %v207_v44 }
  0x90   :  { %1312 = vpow2.f32 %v703_v10  ;;  %63 = vadd.xlane.f32.xlu1 %v62_v11  ;;  %v193_v10 = vshrl.u32 %v185_v1, 13  ;;  %v188_v11 = vmul.u32 2246822507, %v180_v2  ;;  %v758_v21 = vadd.s32 %v752_v8, %v1708_v16 }
  0x91   :  { %v179_v30 = vxor.u32 %v171_v20, %v163_v7  ;;  %v205_v46 = vxor.u32 %v197_v37, %v189_v28  ;;  %v799_v53 = vshrl.u32 %v793_v45, 13  ;;  %v223_v60 = vshrl.u32 %v215_v52, 16 }
  0x92   :  { %v201_v22 = vxor.u32 %v193_v10, %v185_v1  ;;  %v196_v23 = vshrl.u32 %v188_v11, 13  ;;  %v764_v32 = vmul.u32 2654435769, %v758_v21 }
  0x93   :  { %v187_v38 = vmul.u32 2246822507, %v179_v30  ;;  %v213_v54 = vmul.u32 3266489909, %v205_v46  ;;  %v805_v61 = vxor.u32 %v799_v53, %v793_v45  ;;  %v231_v5 = vxor.u32 %v223_v60, %v215_v52 }
  0x94   :  { %v209_v33 = vmul.u32 3266489909, %v201_v22  ;;  %v204_v34 = vxor.u32 %v196_v23, %v188_v11  ;;  %v770_v39 = vadd.s32 %v764_v32, %v1724_v29  ;;  %v755_v52 = vmul.u32 7, %v1720_v24 }
  0x95   :  { %v195_v47 = vshrl.u32 %v187_v38, 13  ;;  %v221_v62 = vshrl.u32 %v213_v54, 16  ;;  %v811_v6 = vmul.u32 3266489909, %v805_v61  ;;  %v239_v15 = vshrl.u32 %v231_v5, 8 }
  0x96   :  { %v1705_v12 = vpop.eup %1312  ;;  %v217_v41 = vshrl.u32 %v209_v33, 16  ;;  %v212_v42 = vmul.u32 3266489909, %v204_v34  ;;  %v776_v48 = vadd.s32 195935983, %v770_v39  ;;  %v754_v24 = vmul.u32 7, %v1710_v18 }
  0x97   :  { %v705_v13 = vsel %vm698_vm1, %v1705_v12, 0.0  ;;  %v203_v55 = vxor.u32 %v195_v47, %v187_v38  ;;  %v229_v7 = vxor.u32 %v221_v62, %v213_v54  ;;  %v817_v17 = vshrl.u32 %v811_v6, 16 }
  0x98   :  { %706 = vadd.xlane.f32.xlu1 %v705_v13  ;;  %v186_v13 = vmul.u32 2246822507, %v178_v3  ;;  %v225_v49 = vxor.u32 %v217_v41, %v209_v33  ;;  %v220_v50 = vshrl.u32 %v212_v42, 16  ;;  %v782_v56 = vshrl.u32 %v776_v48, 16 }
  0x99   :  { %v211_v63 = vmul.u32 3266489909, %v203_v55  ;;  %v237_v20 = vshrl.u32 %v229_v7, 8  ;;  %v247_v27 = vcvt.s32.f32 %v239_v15  ;;  %v823_v28 = vxor.u32 %v817_v17, %v811_v6 }
  0x9a   :  { %v194_v25 = vshrl.u32 %v186_v13, 13  ;;  %v233_v57 = vshrl.u32 %v225_v49, 8  ;;  %v228_v58 = vxor.u32 %v220_v50, %v212_v42  ;;  %v788_v1 = vxor.u32 %v782_v56, %v776_v48 }
  0x9b   :  { %v219_v8 = vshrl.u32 %v211_v63, 16  ;;  %v245_v30 = vcvt.s32.f32 %v237_v20  ;;  %v255_v35 = vmul.f32 5.9604645e-08, %v247_v27  ;;  %v829_v36 = vshrl.u32 %v823_v28, 8 }
  0x9c   :  { %v202_v19 = vxor.u32 %v194_v25, %v186_v13  ;;  %v241_v2 = vcvt.s32.f32 %v233_v57  ;;  %v236_v3 = vshrl.u32 %v228_v58, 8  ;;  %v794_v10 = vmul.u32 2246822507, %v788_v1 }
  0x9d   :  { %v227_v21 = vxor.u32 %v219_v8, %v211_v63  ;;  %v253_v37 = vmul.f32 5.9604645e-08, %v245_v30  ;;  %v263_v41 = vadd.f32 1e-20, %v255_v35  ;;  %v168_v42 = vadd.s32 61453, %v1744_v0 }
  0x9e   :  { %v210_v43 = vmul.u32 3266489909, %v202_v19  ;;  %v249_v11 = vmul.f32 5.9604645e-08, %v241_v2  ;;  %v244_v13 = vcvt.s32.f32 %v236_v3  ;;  %v800_v22 = vshrl.u32 %v794_v10, 13 }
  0x9f   :  { %v235_v32 = vshrl.u32 %v227_v21, 8  ;;  %v835_v44 = vcvt.s32.f32 %v829_v36  ;;  %v261_v45 = vadd.f32 1e-20, %v253_v37  ;;  %v176_v48 = vshrl.u32 %v168_v42, 16 }
  0xa0   :  { %v218_v51 = vshrl.u32 %v210_v43, 16  ;;  %v257_v23 = vadd.f32 1e-20, %v249_v11  ;;  %v252_v25 = vmul.f32 5.9604645e-08, %v244_v13  ;;  %v806_v33 = vxor.u32 %v800_v22, %v794_v10 }
  0xa1   :  { %v243_v38 = vcvt.s32.f32 %v235_v32  ;;  %v841_v50 = vmul.f32 5.9604645e-08, %v835_v44  ;;  %v184_v55 = vxor.u32 %v176_v48, %v168_v42  ;;  %v761_v58 = vadd.s32 %v755_v52, %v1708_v16 }
  0xa2   :  { %v226_v59 = vxor.u32 %v218_v51, %v210_v43  ;;  %1314 = vlog2.f32 %v257_v23  ;;  %v260_v34 = vadd.f32 1e-20, %v252_v25  ;;  %v812_v39 = vmul.u32 3266489909, %v806_v33 }
  0xa3   :  { %v132_v43 = vmul.u32 8, %v1733_v40  ;;  %v251_v46 = vmul.f32 5.9604645e-08, %v243_v38  ;;  %v847_v57 = vadd.f32 1e-20, %v841_v50  ;;  %v192_v61 = vmul.u32 2246822507, %v184_v55 }
  0xa4   :  { %v234_v4 = vshrl.u32 %v226_v59, 8  ;;  %1316 = vlog2.f32 %v260_v34  ;;  %v818_v47 = vshrl.u32 %v812_v39, 16  ;;  %v767_v3 = vmul.u32 2654435769, %v761_v58 }
  0xa5   :  { %v140_v49 = vadd.s32 %v132_v43, %v1708_v16  ;;  %v259_v51 = vadd.f32 1e-20, %v251_v46  ;;  %v200_v6 = vshrl.u32 %v192_v61, 13  ;;  %v760_v23 = vadd.s32 %v754_v24, %v1708_v16 }
  0xa6   :  { %v242_v14 = vcvt.s32.f32 %v234_v4  ;;  %v824_v54 = vxor.u32 %v818_v47, %v812_v39  ;;  %v773_v20 = vadd.s32 %v767_v3, %v1724_v29  ;;  %v753_v50 = vmul.u32 7, %v1727_v31 }
  0xa7   :  { %v148_v56 = vmul.u32 2654435769, %v140_v49  ;;  %v766_v36 = vmul.u32 2654435769, %v760_v23 }
  0xa8   :  { %v250_v26 = vmul.f32 5.9604645e-08, %v242_v14  ;;  %v1315_v53 = vpop.eup %1314  ;;  %v830_v60 = vshrl.u32 %v824_v54, 8  ;;  %v208_v14 = vxor.u32 %v200_v6, %v192_v61  ;;  %v759_v31 = vadd.s32 %v753_v50, %v1708_v16 }
  0xa9   :  { %v266_v0 = vmul.f32 0.6931472, %v1315_v53  ;;  %v158_v62 = vadd.s32 %v1724_v29, %v148_v56  ;;  %v772_v44 = vadd.s32 %v766_v36, %v1724_v29 }
  0xaa   :  { %v258_v19 = vadd.f32 1e-20, %v250_v26  ;;  %v1317_v59 = vpop.eup %1316  ;;  %v836_v8 = vcvt.s32.f32 %v830_v60  ;;  %v216_v18 = vmul.u32 3266489909, %v208_v14 }
  0xab   :  { %v281_v1 = vsub.f32 0.0, %v266_v0  ;;  %v272_v2 = vmul.f32 0.6931472, %v1317_v59  ;;  %v166_v7 = vadd.s32 61453, %v158_v62  ;;  %v778_v0 = vadd.s32 195935983, %v772_v44 }
  0xac   :  { %1318 = vlog2.f32 %v258_v19  ;;  %v842_v25 = vmul.f32 5.9604645e-08, %v836_v8  ;;  %v224_v33 = vshrl.u32 %v216_v18, 16  ;;  %v779_v19 = vadd.s32 195935983, %v773_v20 }
  0xad   :  { %1320 = vlog2.f32 %v263_v41  ;;  %v289_v10 = vadd.f32 1e-20, %v281_v1  ;;  %v284_v11 = vsub.f32 0.0, %v272_v2  ;;  %v174_v17 = vshrl.u32 %v166_v7, 16 }
  0xae   :  { %1322 = vlog2.f32 %v261_v45  ;;  %v848_v38 = vadd.f32 1e-20, %v842_v25  ;;  %v232_v39 = vxor.u32 %v224_v33, %v216_v18  ;;  %v785_v43 = vshrl.u32 %v779_v19, 16 }
  0xaf   :  { %1324 = vlog2.f32 %v259_v51  ;;  %v292_v27 = vadd.f32 1e-20, %v284_v11  ;;  %v182_v34 = vxor.u32 %v174_v17, %v166_v7  ;;  %v784_v3 = vshrl.u32 %v778_v0, 16 }
  0xb0   :  { %1326 = vlog2.f32 %v847_v57  ;;  %v240_v47 = vshrl.u32 %v232_v39, 8  ;;  %v791_v56 = vxor.u32 %v785_v43, %v779_v19  ;;  %v756_v39 = vmul.u32 7, %v1733_v40 }
  0xb1   :  { %1328 = vlog2.f32 %v289_v10  ;;  %v190_v41 = vmul.u32 2246822507, %v182_v34  ;;  %v790_v8 = vxor.u32 %v784_v3, %v778_v0 }
  0xb2   :  { %v1319_v63 = vpop.eup %1318  ;;  %1330 = vlog2.f32 %v292_v27  ;;  %v248_v53 = vcvt.s32.f32 %v240_v47  ;;  %v797_v2 = vmul.u32 2246822507, %v791_v56  ;;  %v762_v0 = vadd.s32 %v756_v39, %v1708_v16 }
  0xb3   :  { %v1321_v4 = vpop.eup %1320  ;;  %v268_v5 = vmul.f32 0.6931472, %v1319_v63  ;;  %v198_v48 = vshrl.u32 %v190_v41, 13 }
  0xb4   :  { %v278_v13 = vmul.f32 0.6931472, %v1321_v4  ;;  %v1323_v15 = vpop.eup %1322  ;;  %v256_v60 = vmul.f32 5.9604645e-08, %v248_v53  ;;  %v803_v7 = vshrl.u32 %v797_v2, 13 }
  0xb5   :  { %v1325_v21 = vpop.eup %1324  ;;  %v282_v22 = vsub.f32 0.0, %v268_v5  ;;  %v274_v30 = vmul.f32 0.6931472, %v1323_v15  ;;  %v206_v54 = vxor.u32 %v198_v48, %v190_v41  ;;  %v765_v15 = vmul.u32 2654435769, %v759_v31 }
  0xb6   :  { %v1327_v26 = vpop.eup %1326  ;;  %v287_v28 = vsub.f32 0.0, %v278_v13  ;;  %v270_v32 = vmul.f32 0.6931472, %v1325_v21  ;;  %v264_v1 = vadd.f32 1e-20, %v256_v60 }
  0xb7   :  { %v290_v35 = vadd.f32 1e-20, %v282_v22  ;;  %v854_v37 = vmul.f32 0.6931472, %v1327_v26  ;;  %v285_v42 = vsub.f32 0.0, %v274_v30  ;;  %v1329_v49 = vpop.eup %1328  ;;  %v771_v19 = vadd.s32 %v765_v15, %v1724_v29 }
  0xb8   :  { %v295_v45 = vadd.f32 1e-20, %v287_v28  ;;  %v283_v46 = vsub.f32 0.0, %v270_v32  ;;  %v1331_v58 = vpop.eup %1330  ;;  %v1764_v59 = vmul.f32 0.6931472, %v1329_v49  ;;  %v809_v28 = vxor.u32 %v803_v7, %v797_v2 }
  0xb9   :  { %1332 = vlog2.f32 %v290_v35  ;;  %v865_v52 = vsub.f32 0.0, %v854_v37  ;;  %v293_v55 = vadd.f32 1e-20, %v285_v42  ;;  %v214_v62 = vmul.u32 3266489909, %v206_v54 }
  0xba   :  { %1334 = vlog2.f32 %v848_v38  ;;  %v291_v57 = vadd.f32 1e-20, %v283_v46  ;;  %v313_v6 = vsub.f32 0.0, %v1764_v59  ;;  %v1773_v20 = vmul.f32 0.6931472, %v1331_v58 }
  0xbb   :  { %v871_v61 = vadd.f32 1e-20, %v865_v52  ;;  %v222_v4 = vshrl.u32 %v214_v62, 16  ;;  %v796_v30 = vmul.u32 2246822507, %v790_v8 }
  0xbc   :  { %v815_v37 = vmul.u32 3266489909, %v809_v28  ;;  %v777_v49 = vadd.s32 195935983, %v771_v19 }
  0xbd   :  { %v230_v14 = vxor.u32 %v222_v4, %v214_v62  ;;  %v802_v38 = vshrl.u32 %v796_v30, 13 }
  0xbe   :  { %v821_v47 = vshrl.u32 %v815_v37, 16  ;;  %v783_v62 = vshrl.u32 %v777_v49, 16 }
  0xbf   :  { %v1333_v63 = vpop.eup %1332  ;;  %v238_v18 = vshrl.u32 %v230_v14, 8  ;;  %v808_v48 = vxor.u32 %v802_v38, %v796_v30 }
  0xc0   :  { %v1335_v24 = vpop.eup %1334  ;;  %v1775_v21 = vmul.f32 0.6931472, %v1333_v63  ;;  %v827_v56 = vxor.u32 %v821_v47, %v815_v37  ;;  %v789_v4 = vxor.u32 %v783_v62, %v777_v49 }
  0xc1   :  { %v856_v25 = vmul.f32 0.6931472, %v1335_v24  ;;  %v246_v34 = vcvt.s32.f32 %v238_v18  ;;  %v814_v60 = vmul.u32 3266489909, %v808_v48 }
  0xc2   :  { %v795_v15 = vmul.u32 2246822507, %v789_v4  ;;  %v314_v19 = vsub.f32 0.0, %v1775_v21 }
  0xc3   :  { %v866_v44 = vsub.f32 0.0, %v856_v25  ;;  %v820_v2 = vshrl.u32 %v814_v60, 16 }
  0xc5   :  { %v872_v3 = vadd.f32 1e-20, %v866_v44 }
 0x103   :  { %v1761_v51 = vpop.xlane.xlu1 %63 }
 0x104   :  { %1336 = vrcp.f32 %v1761_v51  ;;  %v74_v17 = vand.u32 2147483647, %v1761_v51  ;;  %v76_v23 = vand.u32 2147483648, %v1761_v51  ;;  %vm70_vm2 = vweird.f32 %v1761_v51 }
 0x105   :  { %1338 = vlog2.f32 %v295_v45  ;;  %v254_v45 = vmul.f32 5.9604645e-08, %v246_v34  ;;  %v801_v34 = vshrl.u32 %v795_v15, 13 }
 0x106   :  { %1340 = vlog2.f32 %v293_v55  ;;  %vm1782_vm4 = vcmp.eq.f32.partialorder %v74_v17, 8.507059e+37  ;;  %v77_v43 = vor.u32 1.1754944e-38, %v76_v23 }
 0x107   :  { %1342 = vlog2.f32 %v291_v57  ;;  %v262_v55 = vadd.f32 1e-20, %v254_v45  ;;  %v1814_v44 = vxor.u32 %v801_v34, %v795_v15 }
 0x108   :  { %1344 = vlog2.f32 %v264_v1 }
 0x109   :  { %1346 = vlog2.f32 %v871_v61  ;;  %v833_v61 = vshrl.u32 %v827_v56, 8 }
 0x10a   :  { %v1337_v5 = vpop.eup %1336 }
 0x10b   :  { %v1339_v10 = vpop.eup %1338  ;;  %v66_v11 = vmul.f32 %v1337_v5, %v1761_v51  ;;  %v1769_v13 = vpop.xlane.xlu1 %706  ;;  %vm71_vm3 = vweird.f32 %v1337_v5  ;;  %v839_v24 = vcvt.s32.f32 %v833_v61 }
 0x10c   :  { %1348 = vrcp.f32 %v1769_v13  ;;  %v1341_v26 = vpop.eup %1340  ;;  %v1779_v27 = vmul.f32 0.6931472, %v1339_v10  ;;  %vm72_vm5 = vmor %vm70_vm2, %vm71_vm3  ;;  %vm713_vm6 = vweird.f32 %v1769_v13  ;;  %v717_v40 = vand.u32 2147483647, %v1769_v13 }
 0x10d   :  { %v67_v22 = vsub.f32 1.0, %v66_v11  ;;  %v1343_v32 = vpop.eup %1342  ;;  %v719_v58 = vand.u32 2147483648, %v1769_v13  ;;  %1350 = vlog2.f32 %v262_v55  ;;  %v1799_v8 = vmul.f32 0.6931472, %v1341_v26 }
 0x10e   :  { %v1345_v35 = vpop.eup %1344  ;;  %v1804_v11 = vmul.f32 0.6931472, %v1343_v32  ;;  %v845_v14 = vmul.f32 5.9604645e-08, %v839_v24  ;;  %vm718_vm9 = vcmp.eq.f32.partialorder %v717_v40, 8.507059e+37  ;;  %v316_v32 = vsub.f32 0.0, %v1773_v20 }
 0x10f   :  { %v68_v33 = vmul.f32 %v1337_v5, %v67_v22  ;;  %v1787_v41 = vpop.eup %1346  ;;  %v280_v53 = vmul.f32 0.6931472, %v1345_v35  ;;  %v720_v10 = vor.u32 1.1754944e-38, %v719_v58  ;;  %v319_v35 = vsub.f32 0.0, %v1779_v27 }
 0x110   :  { %v851_v28 = vadd.f32 1e-20, %v845_v14  ;;  %v317_v38 = vsub.f32 0.0, %v1799_v8 }
 0x111   :  { %v69_v42 = vadd.f32 %v1337_v5, %v68_v33  ;;  %v288_v1 = vsub.f32 0.0, %v280_v53 }
 0x112   :  { %v1349_v46 = vpop.eup %1348 }
 0x113   :  { %v73_v50 = vsel %vm72_vm5, %v1337_v5, %v69_v42  ;;  %v709_v52 = vmul.f32 %v1349_v46, %v1769_v13  ;;  %vm714_vm7 = vweird.f32 %v1349_v46  ;;  %v768_v5 = vmul.u32 2654435769, %v762_v0  ;;  %v1351_v25 = vpop.eup %1350 }
 0x114   :  { %v78_v54 = vsel %vm1782_vm4, %v77_v43, %v73_v50  ;;  %vm715_vm8 = vmor %vm713_vm6, %vm714_vm7  ;;  %v296_v22 = vadd.f32 1e-20, %v288_v1  ;;  %v276_v33 = vmul.f32 0.6931472, %v1351_v25  ;;  %v813_v1 = vmul.u32 3266489909, %v1814_v44 }
 0x115   :  { %v79_v51 = vmul.f32 %v1701_v9, %v78_v54  ;;  %v710_v57 = vsub.f32 1.0, %v709_v52  ;;  %v826_v9 = vxor.u32 %v820_v2, %v814_v60  ;;  %v774_v26 = vadd.s32 %v768_v5, %v1724_v29 }
 0x116   :  { %v878_v29 = vmul.f32 0.6931472, %v1787_v41  ;;  %v286_v43 = vsub.f32 0.0, %v276_v33 }
 0x117   :  { %v80_v31 = vadd.f32 0.1, %v79_v51  ;;  %v711_v63 = vmul.f32 %v1349_v46, %v710_v57  ;;  %v832_v23 = vshrl.u32 %v826_v9, 8  ;;  %v780_v20 = vadd.s32 195935983, %v774_v26 }
 0x118   :  { %v294_v51 = vadd.f32 1e-20, %v286_v43 }
 0x119   :  { %1352 = vlog2.f32 %v80_v31  ;;  %v712_v7 = vadd.f32 %v1349_v46, %v711_v63  ;;  %v838_v13 = vcvt.s32.f32 %v832_v23  ;;  %v786_v57 = vshrl.u32 %v780_v20, 16 }
 0x11a   :  { %1354 = vlog2.f32 %v872_v3  ;;  %v889_v31 = vsub.f32 0.0, %v878_v29  ;;  %v819_v23 = vshrl.u32 %v813_v1, 16 }
 0x11b   :  { %v716_v17 = vsel %vm715_vm8, %v1349_v46, %v712_v7  ;;  %1356 = vlog2.f32 %v296_v22  ;;  %v844_v39 = vmul.f32 5.9604645e-08, %v838_v13  ;;  %v792_v5 = vxor.u32 %v786_v57, %v780_v20 }
 0x11c   :  { %v721_v18 = vsel %vm718_vm9, %v720_v10, %v716_v17  ;;  %1358 = vlog2.f32 %v851_v28  ;;  %v825_v13 = vxor.u32 %v819_v23, %v813_v1 }
 0x11d   :  { %v722_v30 = vmul.f32 %v1705_v12, %v721_v18  ;;  %v315_v12 = vsub.f32 0.0, %v1804_v11  ;;  %v850_v52 = vadd.f32 1e-20, %v844_v39 }
 0x11e   :  { %v831_v44 = vshrl.u32 %v825_v13, 8 }
 0x11f   :  { %v1353_v36 = vpop.eup %1352  ;;  %v723_v37 = vadd.f32 0.1, %v722_v30 }
 0x120   :  { %v82_v42 = vmul.f32 0.6931472, %v1353_v36  ;;  %v1355_v21 = vpop.eup %1354 }
 0x121   :  { %1360 = vlog2.f32 %v723_v37  ;;  %v1357_v55 = vpop.eup %1356  ;;  %v1828_v61 = vmul.f32 0.6931472, %v1355_v21 }
 0x122   :  { %v91_v45 = vperm.slane %v82_v42, 0  ;;  %v86_v27 = vrot.slane %v82_v42, 3  ;;  %v84_v46 = vrot.slane %v82_v42, 1  ;;  %v89_v47 = vrot.slane %v82_v42, 6  ;;  %v1359_v58 = vpop.eup %1358 }
 0x123   :  { %v87_v48 = vrot.slane %v82_v42, 4  ;;  %v85_v49 = vrot.slane %v82_v42, 2  ;;  %v90_v50 = vrot.slane %v82_v42, 7  ;;  %v88_v0 = vrot.slane %v82_v42, 5 }
 0x124   :  { %v1818_v41 = vadd.f32 %v313_v6, %v91_v45  ;;  %108 = vst.msk [vmem:[#allocation8] sm:$0x3] %vm107_vm10, %v91_v45  ;;  %v94_v40 = vperm.slane %v86_v27, 0  ;;  %v92_v53 = vperm.slane %v84_v46, 0  ;;  %v97_v54 = vperm.slane %v89_v47, 0 }
 0x125   :  { %v1821_v56 = vperm.slane %v87_v48, 0  ;;  %v93_v6 = vperm.slane %v85_v49, 0  ;;  %v1831_v63 = vperm.slane %v90_v50, 0  ;;  %1362 = vlog2.f32 %v850_v52 }
 0x126   :  { %v329_v60 = vsel %vm107_vm10, %v1818_v41, -inf  ;;  %111 = vst.msk [vmem:[#allocation8 + $0x6] sm:$0x3] %vm107_vm10, %v94_v40  ;;  %v1826_v59 = vadd.f32 %v316_v32, %v94_v40  ;;  %v1837_v24 = vadd.f32 %v314_v19, %v92_v53  ;;  %v1841_v4 = vperm.slane %v88_v0, 0 }
 0x127   :  { %v1361_v62 = vpop.eup %1360  ;;  %330 = vmax.xlane.f32.xlu2 %v329_v60  ;;  %109 = vst.msk [vmem:[#allocation8 + $0x2] sm:$0x3] %vm107_vm10, %v92_v53  ;;  %1364 = vlog2.f32 %v294_v51  ;;  %v1844_v15 = vadd.f32 %v319_v35, %v97_v54  ;;  %v862_v17 = vmul.f32 0.6931472, %v1359_v58  ;;  %v312_v36 = vmul.f32 0.6931472, %v1357_v55 }
 0x128   :  { %v725_v2 = vmul.f32 0.6931472, %v1361_v62  ;;  %v338_v3 = vsel %vm107_vm10, %v1826_v59, -inf  ;;  %114 = vst.msk [vmem:[#allocation8 + $0xc] sm:$0x3] %vm107_vm10, %v97_v54  ;;  %v332_v19 = vsel %vm107_vm10, %v1837_v24, -inf  ;;  %v1875_v27 = vadd.f32 %v317_v38, %v1821_v56 }
 0x129   :  { %339 = vmax.xlane.f32.xlu1 %v338_v3  ;;  %112 = vst.msk [vmem:[#allocation8 + $0x8] sm:$0x3] %vm107_vm10, %v1821_v56  ;;  %v869_v30 = vsub.f32 0.0, %v862_v17  ;;  %v347_v29 = vsel %vm107_vm10, %v1844_v15, -inf  ;;  %v890_v43 = vsub.f32 0.0, %v1828_v61  ;;  %v1879_v46 = vadd.f32 %v315_v12, %v93_v6 }
 0x12a   :  { %v732_v7 = vperm.slane %v725_v2, 0  ;;  %110 = vst.msk [vmem:[#allocation8 + $0x4] sm:$0x3] %vm107_vm10, %v93_v6  ;;  %v727_v9 = vrot.slane %v725_v2, 1  ;;  %v730_v10 = vrot.slane %v725_v2, 4  ;;  %v729_v14 = vrot.slane %v725_v2, 3 }
 0x12b   :  { %115 = vst.msk [vmem:[#allocation8 + $0xe] sm:$0x3] %vm107_vm10, %v1831_v63  ;;  %v728_v22 = vrot.slane %v725_v2, 2  ;;  %v731_v34 = vrot.slane %v725_v2, 5  ;;  %v1363_v32 = vpop.eup %1362  ;;  %v875_v39 = vadd.f32 1e-20, %v869_v30  ;;  %v837_v48 = vcvt.s32.f32 %v831_v44 }
 0x12c   :  { %v1848_v25 = vadd.f32 %v889_v31, %v732_v7  ;;  %745 = vst.msk [vmem:[#allocation12] sm:$0x3] %vm744_vm11, %v732_v7  ;;  %v733_v18 = vperm.slane %v727_v9, 0  ;;  %v736_v28 = vperm.slane %v730_v10, 0  ;;  %v1851_v26 = vperm.slane %v729_v14, 0 }
 0x12d   :  { %113 = vst.msk [vmem:[#allocation8 + $0xa] sm:$0x3] %vm107_vm10, %v1841_v4  ;;  %v1855_v33 = vperm.slane %v728_v22, 0  ;;  %v1365_v37 = vpop.eup %1364  ;;  %v860_v42 = vmul.f32 0.6931472, %v1363_v32  ;;  %v1868_v20 = vperm.slane %v731_v34, 0  ;;  %1366 = vlog2.f32 %v875_v39 }
 0x12e   :  { %v901_v35 = vsel %vm744_vm11, %v1848_v25, -inf  ;;  %746 = vst.msk [vmem:[#allocation12 + $0x2] sm:$0x3] %vm744_vm11, %v733_v18  ;;  %v798_v45 = vmul.u32 2246822507, %v792_v5  ;;  %v1883_v52 = vadd.f32 %v890_v43, %v733_v18  ;;  %v843_v40 = vmul.f32 5.9604645e-08, %v837_v48 }
 0x12f   :  { %333 = vmax.xlane.f32.xlu2 %v332_v19  ;;  %902 = vmax.xlane.f32.xlu0 %v901_v35  ;;  %749 = vst.msk [vmem:[#allocation12 + $0x8] sm:$0x3] %vm744_vm11, %v736_v28  ;;  %v868_v21 = vsub.f32 0.0, %v860_v42  ;;  %v308_v47 = vmul.f32 0.6931472, %v1365_v37  ;;  %v320_v53 = vsub.f32 0.0, %v312_v36 }
 0x130   :  { %748 = vst.msk [vmem:[#allocation12 + $0x6] sm:$0x3] %vm744_vm11, %v1851_v26  ;;  %v804_v50 = vshrl.u32 %v798_v45, 13  ;;  %v341_v8 = vsel %vm107_vm10, %v1875_v27, -inf  ;;  %v335_v11 = vsel %vm107_vm10, %v1879_v46, -inf  ;;  %v904_v0 = vsel %vm744_vm11, %v1883_v52, -inf }
 0x131   :  { %348 = vmax.xlane.f32.xlu1 %v347_v29  ;;  %747 = vst.msk [vmem:[#allocation12 + $0x4] sm:$0x3] %vm744_vm11, %v1855_v33  ;;  %v874_v49 = vadd.f32 1e-20, %v868_v21  ;;  %v318_v38 = vsub.f32 0.0, %v308_v47  ;;  %v1892_v58 = vadd.f32 %v320_v53, %v1831_v63 }
 0x132   :  { %750 = vst.msk [vmem:[#allocation12 + $0xa] sm:$0x3] %vm744_vm11, %v1868_v20  ;;  %v810_v54 = vxor.u32 %v804_v50, %v798_v45  ;;  %v849_v12 = vadd.f32 1e-20, %v843_v40  ;;  %1189 = dma.vmem_to_hbm [thread:$0]  %s1182_s25, 256, %s1184_s23, [#allocation5], %s1641_s20, %s1641_s20, %s1642_s21  }
 0x133   :  { %1368 = vlog2.f32 %v874_v49  ;;  %v1367_v55 = vpop.eup %1366  ;;  %v1895_v60 = vadd.f32 %v318_v38, %v1841_v4  ;;  %v350_v5 = vsel %vm107_vm10, %v1892_v58, -inf  ;;  %1228 = dma.vmem_to_hbm [thread:$0]  %s1221_s16, 192, %s1223_s19, [#allocation13], %s1641_s20, %s1641_s20, %s1642_s21  }
 0x134   :  { %v816_v56 = vmul.u32 3266489909, %v810_v54  ;;  %v886_v51 = vmul.f32 0.6931472, %v1367_v55  ;;  %1370 = vlog2.f32 %v849_v12  ;;  %s1248_s16 = sshll.u32 %s2544_s8, 4  ;;  %s1249_s16 = int_to_ptr.hbm [resolvable:$true] %s1248_s16 }
 0x135   :  { %v344_v7 = vsel %vm107_vm10, %v1895_v60, -inf }
 0x136   :  { %v822_v57 = vshrl.u32 %v816_v56, 16  ;;  %v893_v6 = vsub.f32 0.0, %v886_v51 }
 0x137   :  { %342 = vmax.xlane.f32.xlu2 %v341_v8  ;;  %336 = vmax.xlane.f32.xlu0 %v335_v11 }
 0x138   :  { %v828_v62 = vxor.u32 %v822_v57, %v816_v56  ;;  %v1897_v31 = vadd.f32 %v893_v6, %v736_v28 }
 0x139   :  { %905 = vmax.xlane.f32.xlu1 %v904_v0  ;;  %v1369_v61 = vpop.eup %1368 }
 0x13a   :  { %v884_v1 = vmul.f32 0.6931472, %v1369_v61  ;;  %v834_v2 = vshrl.u32 %v828_v62, 8  ;;  %v1371_v3 = vpop.eup %1370  ;;  %v913_v10 = vsel %vm744_vm11, %v1897_v31, -inf }
 0x13b   :  { %v858_v63 = vmul.f32 0.6931472, %v1371_v3 }
 0x13c   :  { %v892_v9 = vsub.f32 0.0, %v884_v1  ;;  %v840_v4 = vcvt.s32.f32 %v834_v2 }
 0x13d   :  { %v867_v14 = vsub.f32 0.0, %v858_v63 }
 0x13e   :  { %v846_v17 = vmul.f32 5.9604645e-08, %v840_v4  ;;  %v1906_v22 = vadd.f32 %v892_v9, %v1851_v26 }
 0x13f   :  { %351 = vmax.xlane.f32.xlu2 %v350_v5  ;;  %345 = vmax.xlane.f32.xlu0 %v344_v7  ;;  %v873_v23 = vadd.f32 1e-20, %v867_v14 }
 0x140   :  { %v852_v18 = vadd.f32 1e-20, %v846_v17  ;;  %v910_v28 = vsel %vm744_vm11, %v1906_v22, -inf }
 0x141   :  { %914 = vmax.xlane.f32.xlu1 %v913_v10  ;;  %1372 = vlog2.f32 %v873_v23 }
 0x142   :  { %1374 = vlog2.f32 %v852_v18 }
 0x147   :  { %911 = vmax.xlane.f32.xlu0 %v910_v28  ;;  %v1373_v30 = vpop.eup %1372 }
 0x148   :  { %v1375_v13 = vpop.eup %1374  ;;  %v882_v34 = vmul.f32 0.6931472, %v1373_v30 }
 0x149   :  { %v864_v32 = vmul.f32 0.6931472, %v1375_v13 }
 0x14a   :  { %v891_v19 = vsub.f32 0.0, %v882_v34 }
 0x14b   :  { %v870_v35 = vsub.f32 0.0, %v864_v32 }
 0x14c   :  { %v1911_v36 = vadd.f32 %v891_v19, %v1855_v33 }
 0x14d   :  { %v876_v37 = vadd.f32 1e-20, %v870_v35 }
 0x14e   :  { %v907_v26 = vsel %vm744_vm11, %v1911_v36, -inf }
 0x14f   :  { %908 = vmax.xlane.f32.xlu2 %v907_v26  ;;  %1376 = vlog2.f32 %v876_v37 }
 0x155   :  { %v1377_v39 = vpop.eup %1376 }
 0x156   :  { %v888_v42 = vmul.f32 0.6931472, %v1377_v39 }
 0x158   :  { %v894_v29 = vsub.f32 0.0, %v888_v42 }
 0x15a   :  { %v1916_v43 = vadd.f32 %v894_v29, %v1868_v20 }
 0x15c   :  { %v916_v44 = vsel %vm744_vm11, %v1916_v43, -inf }
 0x15d   :  { %917 = vmax.xlane.f32.xlu2 %v916_v44 }
 0x19a   :  { %v1920_v21 = vpop.xlane.xlu2 %330 }
 0x19b   :  { %vm529_vm12 = vcmp.ge.f32.partialorder %v1818_v41, %v1920_v21  ;;  %v353_v26 = vsub.f32 %v1818_v41, %v1920_v21 }
 0x19c   :  { %v537_v33 = vsel %vm529_vm12, %v1708_v16, 8  ;;  %v1925_v45 = vpop.xlane.xlu1 %339 }
 0x19d   :  { %v1928_v47 = vsel %vm107_vm10, %v537_v33, 2147483647  ;;  %vm532_vm15 = vcmp.ge.f32.partialorder %v1826_v59, %v1925_v45  ;;  %v361_v21 = vmul.f32 1.442695, %v353_v26 }
 0x19e   :  { %v547_v48 = vshra.s32 %v1928_v47, 16  ;;  %v540_v55 = vsel %vm532_vm15, %v1708_v16, 8 }
 0x19f   :  { %v1971_v6 = vsel %vm107_vm10, %v540_v55, 2147483647  ;;  %1378 = vpow2.f32 %v361_v21 }
 0x1a0   :  { %v1931_v20 = vcvt.s32.f32 %v547_v48  ;;  %v592_v3 = vshra.s32 %v1971_v6, 16 }
 0x1a2   :  { %v1933_v49 = vpop.xlane.xlu2 %333  ;;  %v1935_v50 = vpop.xlane.xlu0 %902  ;;  %550 = vmin.xlane.f32.xlu2 %v1931_v20  ;;  %v1998_v23 = vcvt.s32.f32 %v592_v3 }
 0x1a3   :  { %vm530_vm13 = vcmp.ge.f32.partialorder %v1837_v24, %v1933_v49  ;;  %vm1051_vm14 = vcmp.ge.f32.partialorder %v1848_v25, %v1935_v50 }
 0x1a4   :  { %v538_v40 = vsel %vm530_vm13, %v1708_v16, 8  ;;  %v1057_v53 = vsel %vm1051_vm14, %v1708_v16, 7  ;;  %v1946_v54 = vpop.xlane.xlu1 %348 }
 0x1a5   :  { %v1949_v8 = vsel %vm744_vm11, %v1057_v53, 2147483647  ;;  %v1952_v11 = vsel %vm107_vm10, %v538_v40, 2147483647  ;;  %vm535_vm2 = vcmp.ge.f32.partialorder %v1844_v15, %v1946_v54 }
 0x1a6   :  { %v1065_v38 = vshra.s32 %v1949_v8, 16  ;;  %v562_v12 = vshra.s32 %v1952_v11, 16  ;;  %v543_v9 = vsel %vm535_vm2, %v1708_v16, 8 }
 0x1a7   :  { %v2006_v18 = vsel %vm107_vm10, %v543_v9, 2147483647 }
 0x1a8   :  { %v1957_v56 = vcvt.s32.f32 %v1065_v38  ;;  %v1959_v0 = vcvt.s32.f32 %v562_v12  ;;  %v637_v32 = vshra.s32 %v2006_v18, 16  ;;  %v354_v12 = vsub.f32 %v1837_v24, %v1933_v49 }
 0x1aa   :  { %v1961_v51 = vpop.xlane.xlu2 %342  ;;  %v1963_v57 = vpop.xlane.xlu0 %336  ;;  %1068 = vmin.xlane.f32.xlu0 %v1957_v56  ;;  %565 = vmin.xlane.f32.xlu1 %v1959_v0  ;;  %v2034_v33 = vcvt.s32.f32 %v637_v32 }
 0x1ab   :  { %vm533_vm0 = vcmp.ge.f32.partialorder %v1875_v27, %v1961_v51  ;;  %vm531_vm1 = vcmp.ge.f32.partialorder %v1879_v46, %v1963_v57  ;;  %v357_v32 = vsub.f32 %v1875_v27, %v1961_v51  ;;  %v359_v27 = vsub.f32 %v1844_v15, %v1946_v54 }
 0x1ac   :  { %v541_v61 = vsel %vm533_vm0, %v1708_v16, 8  ;;  %v539_v62 = vsel %vm531_vm1, %v1708_v16, 8  ;;  %v1988_v63 = vpop.xlane.xlu1 %905  ;;  %v355_v51 = vsub.f32 %v1879_v46, %v1963_v57 }
 0x1ad   :  { %v1979_v1 = vsel %vm107_vm10, %v539_v62, 2147483647  ;;  %v1982_v2 = vsel %vm107_vm10, %v541_v61, 2147483647  ;;  %vm1052_vm5 = vcmp.ge.f32.partialorder %v1883_v52, %v1988_v63  ;;  %v919_v62 = vsub.f32 %v1848_v25, %v1935_v50 }
 0x1ae   :  { %v577_v5 = vshra.s32 %v1979_v1, 16  ;;  %v607_v7 = vshra.s32 %v1982_v2, 16  ;;  %v1058_v37 = vsel %vm1052_vm5, %v1708_v16, 7  ;;  %v356_v50 = vsub.f32 %v1826_v59, %v1925_v45 }
 0x1af   :  { %v2040_v48 = vsel %vm744_vm11, %v1058_v37, 2147483647  ;;  %v925_v9 = vmul.f32 1.442695, %v919_v62 }
 0x1b0   :  { %v1990_v4 = vcvt.s32.f32 %v577_v5  ;;  %v1992_v10 = vcvt.s32.f32 %v607_v7  ;;  %v1080_v38 = vshra.s32 %v2040_v48, 16  ;;  %v363_v7 = vmul.f32 1.442695, %v354_v12 }
 0x1b1   :  { %v367_v59 = vmul.f32 1.442695, %v356_v50 }
 0x1b2   :  { %v1994_v14 = vpop.xlane.xlu2 %351  ;;  %v1996_v17 = vpop.xlane.xlu0 %345  ;;  %580 = vmin.xlane.f32.xlu0 %v1990_v4  ;;  %610 = vmin.xlane.f32.xlu2 %v1992_v10  ;;  %v2059_v3 = vcvt.s32.f32 %v1080_v38  ;;  %1380 = vpow2.f32 %v363_v7  ;;  %v365_v7 = vmul.f32 1.442695, %v355_v51 }
 0x1b3   :  { %vm536_vm3 = vcmp.ge.f32.partialorder %v1892_v58, %v1994_v14  ;;  %vm534_vm4 = vcmp.ge.f32.partialorder %v1895_v60, %v1996_v17  ;;  %595 = vmin.xlane.f32.xlu1 %v1998_v23  ;;  %1382 = vpow2.f32 %v925_v9 }
 0x1b4   :  { %v544_v28 = vsel %vm536_vm3, %v1708_v16, 8  ;;  %v542_v30 = vsel %vm534_vm4, %v1708_v16, 8  ;;  %v2030_v29 = vpop.xlane.xlu1 %914  ;;  %1384 = vpow2.f32 %v367_v59 }
 0x1b5   :  { %v2015_v13 = vsel %vm107_vm10, %v542_v30, 2147483647  ;;  %v2018_v34 = vsel %vm107_vm10, %v544_v28, 2147483647  ;;  %vm1055_vm7 = vcmp.ge.f32.partialorder %v1897_v31, %v2030_v29  ;;  %v2069_v28 = vpop.eup %1378 }
 0x1b6   :  { %v622_v19 = vshra.s32 %v2015_v13, 16  ;;  %v652_v35 = vshra.s32 %v2018_v34, 16  ;;  %v1061_v55 = vsel %vm1055_vm7, %v1708_v16, 7 }
 0x1b7   :  { %v2063_v5 = vsel %vm744_vm11, %v1061_v55, 2147483647  ;;  %v373_v55 = vmul.f32 1.442695, %v359_v27 }
 0x1b8   :  { %v2026_v39 = vcvt.s32.f32 %v622_v19  ;;  %v2028_v42 = vcvt.s32.f32 %v652_v35  ;;  %v1125_v49 = vshra.s32 %v2063_v5, 16  ;;  %v377_v35 = vsel %vm107_vm10, %v2069_v28, 0.0  ;;  %v2089_v45 = vpop.eup %1380 }
 0x1b9   :  { %v2092_v21 = vpop.eup %1382  ;;  %v380_v12 = vsel %vm107_vm10, %v2089_v45, 0.0 }
 0x1ba   :  { %v2032_v44 = vpop.xlane.xlu0 %911  ;;  %625 = vmin.xlane.f32.xlu0 %v2026_v39  ;;  %655 = vmin.xlane.f32.xlu2 %v2028_v42  ;;  %v2084_v37 = vcvt.s32.f32 %v1125_v49  ;;  %v937_v38 = vsel %vm744_vm11, %v2092_v21, 0.0  ;;  %v2106_v54 = vpop.eup %1384 }
 0x1bb   :  { %vm1054_vm6 = vcmp.ge.f32.partialorder %v1906_v22, %v2032_v44  ;;  %640 = vmin.xlane.f32.xlu1 %v2034_v33  ;;  %v922_v49 = vsub.f32 %v1906_v22, %v2032_v44 }
 0x1bc   :  { %v1060_v41 = vsel %vm1054_vm6, %v1708_v16, 7 }
 0x1bd   :  { %v2048_v40 = vsel %vm744_vm11, %v1060_v41, 2147483647  ;;  %v369_v41 = vmul.f32 1.442695, %v357_v32  ;;  %v386_v32 = vsel %vm107_vm10, %v2106_v54, 0.0 }
 0x1be   :  { %v1110_v53 = vshra.s32 %v2048_v40, 16 }
 0x1bf   :  { %1386 = vpow2.f32 %v369_v41 }
 0x1c0   :  { %v2055_v61 = vcvt.s32.f32 %v1110_v53  ;;  %v360_v53 = vsub.f32 %v1892_v58, %v1994_v14  ;;  %1388 = vpow2.f32 %v373_v55  ;;  %v920_v14 = vsub.f32 %v1883_v52, %v1988_v63 }
 0x1c1   :  { %1390 = vpow2.f32 %v365_v7  ;;  %v931_v63 = vmul.f32 1.442695, %v922_v49 }
 0x1c2   :  { %1113 = vmin.xlane.f32.xlu0 %v2055_v61  ;;  %v2066_v24 = vpop.xlane.xlu2 %908  ;;  %v375_v15 = vmul.f32 1.442695, %v360_v53  ;;  %v927_v52 = vmul.f32 1.442695, %v920_v14 }
 0x1c3   :  { %1083 = vmin.xlane.f32.xlu1 %v2059_v3  ;;  %vm1053_vm8 = vcmp.ge.f32.partialorder %v1911_v36, %v2066_v24  ;;  %v921_v59 = vsub.f32 %v1911_v36, %v2066_v24 }
 0x1c4   :  { %v1059_v25 = vsel %vm1053_vm8, %v1708_v16, 7  ;;  %1392 = vpow2.f32 %v375_v15 }
 0x1c5   :  { %v2077_v30 = vsel %vm744_vm11, %v1059_v25, 2147483647  ;;  %v2111_v57 = vpop.eup %1386  ;;  %v358_v25 = vsub.f32 %v1895_v60, %v1996_v17  ;;  %1394 = vpow2.f32 %v927_v52  ;;  %v923_v17 = vsub.f32 %v1897_v31, %v2030_v29 }
 0x1c6   :  { %v1095_v19 = vshra.s32 %v2077_v30, 16  ;;  %1396 = vpow2.f32 %v931_v63  ;;  %v929_v31 = vmul.f32 1.442695, %v921_v59  ;;  %v1064_v63 = vand.u32 65535, %v1949_v8 }
 0x1c7   :  { %v371_v22 = vmul.f32 1.442695, %v358_v25  ;;  %v933_v53 = vmul.f32 1.442695, %v923_v17  ;;  %v546_v25 = vand.u32 65535, %v1928_v47  ;;  %v576_v8 = vand.u32 65535, %v1979_v1 }
 0x1c8   :  { %v2086_v26 = vcvt.s32.f32 %v1095_v19  ;;  %v389_v19 = vsel %vm107_vm10, %v2111_v57, 0.0  ;;  %v1066_v59 = vcvt.s32.f32 %v1064_v63 }
 0x1c9   :  { %1398 = vpow2.f32 %v371_v22  ;;  %v561_v22 = vand.u32 65535, %v1952_v11  ;;  %v606_v11 = vand.u32 65535, %v1982_v2 }
 0x1ca   :  { %378 = vadd.xlane.f32.xlu0 %v377_v35  ;;  %1098 = vmin.xlane.f32.xlu2 %v2086_v26  ;;  %v2127_v35 = vpop.eup %1388  ;;  %1400 = vpow2.f32 %v933_v53 }
 0x1cb   :  { %1128 = vmin.xlane.f32.xlu1 %v2084_v37  ;;  %v2129_v44 = vpop.eup %1390  ;;  %v395_v41 = vsel %vm107_vm10, %v2127_v35, 0.0  ;;  %1402 = vpow2.f32 %v929_v31  ;;  %v563_v47 = vcvt.s32.f32 %v561_v22  ;;  %v578_v31 = vcvt.s32.f32 %v576_v8 }
 0x1cc   :  { %v2131_v60 = vpop.eup %1392  ;;  %v383_v27 = vsel %vm107_vm10, %v2129_v44, 0.0 }
 0x1cd   :  { %v398_v51 = vsel %vm107_vm10, %v2131_v60, 0.0 }
 0x1d0   :  { %v918_v62 = vpop.xlane.xlu2 %917 }
 0x1d1   :  { %vm1056_vm9 = vcmp.ge.f32.partialorder %v1916_v43, %v918_v62  ;;  %v924_v36 = vsub.f32 %v1916_v43, %v918_v62 }
 0x1d2   :  { %938 = vadd.xlane.f32.xlu0 %v937_v38  ;;  %v1062_v46 = vsel %vm1056_vm9, %v1708_v16, 7  ;;  %v2143_v38 = vpop.eup %1394 }
 0x1d3   :  { %381 = vadd.xlane.f32.xlu1 %v380_v12  ;;  %v2109_v58 = vsel %vm744_vm11, %v1062_v46, 2147483647  ;;  %v2145_v29 = vpop.eup %1396  ;;  %v940_v7 = vsel %vm744_vm11, %v2143_v38, 0.0  ;;  %v935_v15 = vmul.f32 1.442695, %v924_v36 }
 0x1d4   :  { %v1140_v9 = vshra.s32 %v2109_v58, 16  ;;  %v2147_v12 = vpop.eup %1398  ;;  %v946_v24 = vsel %vm744_vm11, %v2145_v29, 0.0 }
 0x1d5   :  { %v392_v55 = vsel %vm107_vm10, %v2147_v12, 0.0  ;;  %v2156_v46 = vpop.eup %1400  ;;  %1404 = vpow2.f32 %v935_v15 }
 0x1d6   :  { %v2120_v50 = vcvt.s32.f32 %v1140_v9  ;;  %v2158_v14 = vpop.eup %1402  ;;  %v949_v62 = vsel %vm744_vm11, %v2156_v46, 0.0 }
 0x1d7   :  { %v943_v43 = vsel %vm744_vm11, %v2158_v14, 0.0 }
 0x1d8   :  { %1143 = vmin.xlane.f32.xlu2 %v2120_v50 }
 0x1da   :  { %387 = vadd.xlane.f32.xlu0 %v386_v32 }
 0x1db   :  { %390 = vadd.xlane.f32.xlu1 %v389_v19  ;;  %v2164_v9 = vpop.eup %1404  ;;  %v548_v19 = vcvt.s32.f32 %v546_v25  ;;  %v1109_v25 = vand.u32 65535, %v2048_v40  ;;  %v1124_v40 = vand.u32 65535, %v2063_v5 }
 0x1dc   :  { %v952_v49 = vsel %vm744_vm11, %v2164_v9, 0.0 }
 0x1e0   :  { %384 = vadd.xlane.f32.xlu2 %v383_v27 }
 0x1e2   :  { %396 = vadd.xlane.f32.xlu0 %v395_v41 }
 0x1e3   :  { %399 = vadd.xlane.f32.xlu1 %v398_v51  ;;  %v591_v51 = vand.u32 65535, %v1971_v6 }
 0x1e5   :  { %v593_v1 = vcvt.s32.f32 %v591_v51 }
 0x1e8   :  { %393 = vadd.xlane.f32.xlu2 %v392_v55  ;;  %v621_v55 = vand.u32 65535, %v2015_v13 }
 0x1ea   :  { %947 = vadd.xlane.f32.xlu0 %v946_v24 }
 0x1eb   :  { %941 = vadd.xlane.f32.xlu1 %v940_v7  ;;  %v651_v7 = vand.u32 65535, %v2018_v34 }
 0x1f0   :  { %944 = vadd.xlane.f32.xlu2 %v943_v43  ;;  %v623_v43 = vcvt.s32.f32 %v621_v55 }
 0x1f3   :  { %950 = vadd.xlane.f32.xlu1 %v949_v62 }
 0x1f8   :  { %953 = vadd.xlane.f32.xlu2 %v952_v49 }
 0x215   :  { %v2169_v32 = vpop.xlane.xlu2 %550 }
 0x216   :  { %vm552_vm12 = vcmp.eq.f32.partialorder %v1931_v20, %v2169_v32 }
 0x217   :  { %v553_v52 = vsel %vm552_vm12, %v548_v19, inf  ;;  %v1079_v19 = vand.u32 65535, %v2040_v48  ;;  %v1094_v48 = vand.u32 65535, %v2077_v30 }
 0x218   :  { %554 = vmin.xlane.f32.xlu0 %v553_v52 }
 0x21d   :  { %v2175_v17 = vpop.xlane.xlu0 %1068  ;;  %v2177_v41 = vpop.xlane.xlu1 %565 }
 0x21e   :  { %vm1070_vm13 = vcmp.eq.f32.partialorder %v1957_v56, %v2175_v17  ;;  %vm567_vm14 = vcmp.eq.f32.partialorder %v1959_v0, %v2177_v41  ;;  %v608_v0 = vcvt.s32.f32 %v606_v11 }
 0x21f   :  { %v1071_v27 = vsel %vm1070_vm13, %v1066_v59, inf  ;;  %v568_v20 = vsel %vm567_vm14, %v563_v47, inf }
 0x220   :  { %1072 = vmin.xlane.f32.xlu0 %v1071_v27  ;;  %569 = vmin.xlane.f32.xlu2 %v568_v20  ;;  %v1126_v27 = vcvt.s32.f32 %v1124_v40  ;;  %v1096_v20 = vcvt.s32.f32 %v1094_v48 }
 0x225   :  { %v2186_v53 = vpop.xlane.xlu0 %580  ;;  %v2188_v36 = vpop.xlane.xlu2 %610 }
 0x226   :  { %v2190_v56 = vpop.xlane.xlu1 %595  ;;  %vm582_vm15 = vcmp.eq.f32.partialorder %v1990_v4, %v2186_v53  ;;  %vm612_vm0 = vcmp.eq.f32.partialorder %v1992_v10, %v2188_v36  ;;  %v636_v4 = vand.u32 65535, %v2006_v18 }
 0x227   :  { %v583_v24 = vsel %vm582_vm15, %v578_v31, inf  ;;  %v613_v2 = vsel %vm612_vm0, %v608_v0, inf  ;;  %vm597_vm1 = vcmp.eq.f32.partialorder %v1998_v23, %v2190_v56  ;;  %v653_v23 = vcvt.s32.f32 %v651_v7 }
 0x228   :  { %584 = vmin.xlane.f32.xlu0 %v583_v24  ;;  %614 = vmin.xlane.f32.xlu2 %v613_v2  ;;  %v598_v6 = vsel %vm597_vm1, %v593_v1, inf  ;;  %v638_v13 = vcvt.s32.f32 %v636_v4 }
 0x229   :  { %599 = vmin.xlane.f32.xlu1 %v598_v6 }
 0x22d   :  { %v2201_v15 = vpop.xlane.xlu0 %625  ;;  %v2203_v62 = vpop.xlane.xlu2 %655 }
 0x22e   :  { %v2205_v10 = vpop.xlane.xlu1 %640  ;;  %vm627_vm2 = vcmp.eq.f32.partialorder %v2026_v39, %v2201_v15  ;;  %vm657_vm3 = vcmp.eq.f32.partialorder %v2028_v42, %v2203_v62  ;;  %v1111_v39 = vcvt.s32.f32 %v1109_v25  ;;  %v1081_v42 = vcvt.s32.f32 %v1079_v19 }
 0x22f   :  { %v628_v49 = vsel %vm627_vm2, %v623_v43, inf  ;;  %v658_v34 = vsel %vm657_vm3, %v653_v23, inf  ;;  %vm642_vm4 = vcmp.eq.f32.partialorder %v2034_v33, %v2205_v10 }
 0x230   :  { %629 = vmin.xlane.f32.xlu0 %v628_v49  ;;  %659 = vmin.xlane.f32.xlu2 %v658_v34  ;;  %v643_v18 = vsel %vm642_vm4, %v638_v13, inf }
 0x231   :  { %644 = vmin.xlane.f32.xlu1 %v643_v18 }
 0x235   :  { %v2215_v52 = vpop.xlane.xlu0 %1113 }
 0x236   :  { %v2217_v63 = vpop.xlane.xlu1 %1083  ;;  %vm1115_vm5 = vcmp.eq.f32.partialorder %v2055_v61, %v2215_v52 }
 0x237   :  { %v1116_v22 = vsel %vm1115_vm5, %v1111_v39, inf  ;;  %vm1085_vm6 = vcmp.eq.f32.partialorder %v2059_v3, %v2217_v63 }
 0x238   :  { %1117 = vmin.xlane.f32.xlu0 %v1116_v22  ;;  %v1086_v33 = vsel %vm1085_vm6, %v1081_v42, inf }
 0x239   :  { %1087 = vmin.xlane.f32.xlu1 %v1086_v33 }
 0x23d   :  { %v379_v59 = vpop.xlane.xlu0 %378  ;;  %v2229_v61 = vpop.xlane.xlu2 %1098 }
 0x23e   :  { %1406 = vrcp.f32 %v379_v59  ;;  %v2225_v47 = vpop.xlane.xlu1 %1128  ;;  %vm1100_vm8 = vcmp.eq.f32.partialorder %v2086_v26, %v2229_v61  ;;  %v412_v31 = vand.u32 2147483648, %v379_v59  ;;  %v410_v24 = vand.u32 2147483647, %v379_v59 }
 0x23f   :  { %vm1130_vm7 = vcmp.eq.f32.partialorder %v2084_v37, %v2225_v47  ;;  %v1101_v3 = vsel %vm1100_vm8, %v1096_v20, inf  ;;  %v1139_v37 = vand.u32 65535, %v2109_v58  ;;  %vm406_vm12 = vweird.f32 %v379_v59 }
 0x240   :  { %v1131_v8 = vsel %vm1130_vm7, %v1126_v27, inf  ;;  %1102 = vmin.xlane.f32.xlu2 %v1101_v3  ;;  %v413_v6 = vor.u32 1.1754944e-38, %v412_v31  ;;  %vm411_vm14 = vcmp.eq.f32.partialorder %v410_v24, 8.507059e+37 }
 0x241   :  { %1132 = vmin.xlane.f32.xlu1 %v1131_v8  ;;  %v1141_v23 = vcvt.s32.f32 %v1139_v37 }
 0x244   :  { %v1407_v5 = vpop.eup %1406 }
 0x245   :  { %v402_v30 = vmul.f32 %v1407_v5, %v379_v59  ;;  %v939_v11 = vpop.xlane.xlu0 %938  ;;  %vm407_vm9 = vweird.f32 %v1407_v5 }
 0x246   :  { %1408 = vrcp.f32 %v939_v11  ;;  %v2234_v1 = vpop.xlane.xlu1 %381  ;;  %vm408_vm13 = vmor %vm406_vm12, %vm407_vm9  ;;  %v966_v34 = vand.u32 2147483648, %v939_v11  ;;  %vm960_vm1 = vweird.f32 %v939_v11 }
 0x247   :  { %v403_v51 = vsub.f32 1.0, %v402_v30  ;;  %1410 = vrcp.f32 %v2234_v1  ;;  %v425_v48 = vand.u32 2147483647, %v2234_v1  ;;  %v427_v59 = vand.u32 2147483648, %v2234_v1 }
 0x248   :  { %v967_v22 = vor.u32 1.1754944e-38, %v966_v34  ;;  %vm421_vm5 = vweird.f32 %v2234_v1 }
 0x249   :  { %v404_v0 = vmul.f32 %v1407_v5, %v403_v51  ;;  %vm426_vm7 = vcmp.eq.f32.partialorder %v425_v48, 8.507059e+37 }
 0x24b   :  { %v405_v2 = vadd.f32 %v1407_v5, %v404_v0  ;;  %v2237_v43 = vpop.xlane.xlu2 %1143 }
 0x24c   :  { %v1409_v26 = vpop.eup %1408  ;;  %vm1145_vm15 = vcmp.eq.f32.partialorder %v2120_v50, %v2237_v43 }
 0x24d   :  { %v409_v55 = vsel %vm408_vm13, %v1407_v5, %v405_v2  ;;  %v956_v7 = vmul.f32 %v1409_v26, %v939_v11  ;;  %v1146_v13 = vsel %vm1145_vm15, %v1141_v23, inf  ;;  %v1411_v18 = vpop.eup %1410  ;;  %vm961_vm0 = vweird.f32 %v1409_v26  ;;  %v2250_v19 = vpop.xlane.xlu0 %387 }
 0x24e   :  { %v414_v4 = vsel %vm411_vm14, %v413_v6, %v409_v55  ;;  %1147 = vmin.xlane.f32.xlu2 %v1146_v13  ;;  %v417_v50 = vmul.f32 %v1411_v18, %v2234_v1  ;;  %v2252_v39 = vpop.xlane.xlu1 %390  ;;  %1412 = vrcp.f32 %v2250_v19  ;;  %vm962_vm2 = vmor %vm960_vm1, %vm961_vm0  ;;  %vm422_vm4 = vweird.f32 %v1411_v18 }
 0x24f   :  { %v415_v49 = vmul.f32 %v2069_v28, %v414_v4  ;;  %v957_v58 = vsub.f32 1.0, %v956_v7  ;;  %v964_v28 = vand.u32 2147483647, %v939_v11  ;;  %1414 = vrcp.f32 %v2252_v39  ;;  %vm423_vm6 = vmor %vm421_vm5, %vm422_vm4 }
 0x250   :  { %v418_v33 = vsub.f32 1.0, %v417_v50  ;;  %v428_v11 = vor.u32 1.1754944e-38, %v427_v59  ;;  %vm451_vm8 = vweird.f32 %v2250_v19  ;;  %v455_v24 = vand.u32 2147483647, %v2250_v19 }
 0x251   :  { %521 = vst.msk [vmem:[#allocation9] sm:$0x3] %vm107_vm10, %v415_v49  ;;  %v958_v25 = vmul.f32 %v1409_v26, %v957_v58  ;;  %vm965_vm3 = vcmp.eq.f32.partialorder %v964_v28, 8.507059e+37  ;;  %v470_v6 = vand.u32 2147483647, %v2252_v39  ;;  %vm466_vm9 = vweird.f32 %v2252_v39 }
 0x252   :  { %v419_v8 = vmul.f32 %v1411_v18, %v418_v33  ;;  %v472_v4 = vand.u32 2147483648, %v2252_v39  ;;  %vm2292_vm13 = vcmp.eq.f32.partialorder %v455_v24, 8.507059e+37 }
 0x253   :  { %v959_v42 = vadd.f32 %v1409_v26, %v958_v25  ;;  %v2265_v20 = vpop.xlane.xlu2 %384  ;;  %vm2298_vm15 = vcmp.eq.f32.partialorder %v470_v6, 8.507059e+37 }
 0x254   :  { %1416 = vrcp.f32 %v2265_v20  ;;  %v420_v5 = vadd.f32 %v1411_v18, %v419_v8  ;;  %v1413_v30 = vpop.eup %1412  ;;  %v440_v49 = vand.u32 2147483647, %v2265_v20  ;;  %v442_v58 = vand.u32 2147483648, %v2265_v20 }
 0x255   :  { %v963_v40 = vsel %vm962_vm2, %v1409_v26, %v959_v42  ;;  %v1415_v51 = vpop.eup %1414  ;;  %v447_v0 = vmul.f32 %v1413_v30, %v2250_v19  ;;  %v2275_v37 = vpop.xlane.xlu0 %396  ;;  %vm452_vm12 = vweird.f32 %v1413_v30  ;;  %vm436_vm14 = vweird.f32 %v2265_v20 }
 0x256   :  { %v968_v27 = vsel %vm965_vm3, %v967_v22, %v963_v40  ;;  %v424_v31 = vsel %vm423_vm6, %v1411_v18, %v420_v5  ;;  %v2277_v2 = vpop.xlane.xlu1 %399  ;;  %v462_v26 = vmul.f32 %v1415_v51, %v2252_v39  ;;  %1418 = vrcp.f32 %v2275_v37  ;;  %vm453_vm3 = vmor %vm451_vm8, %vm452_vm12 }
 0x257   :  { %v969_v3 = vmul.f32 %v2092_v21, %v968_v27  ;;  %v457_v21 = vand.u32 2147483648, %v2250_v19  ;;  %v429_v1 = vsel %vm426_vm7, %v428_v11, %v424_v31  ;;  %v448_v7 = vsub.f32 1.0, %v447_v0 }
 0x258   :  { %v430_v55 = vmul.f32 %v2089_v45, %v429_v1  ;;  %v463_v13 = vsub.f32 1.0, %v462_v26  ;;  %1420 = vrcp.f32 %v2277_v2  ;;  %vm467_vm0 = vweird.f32 %v1415_v51 }
 0x259   :  { %1045 = vst.msk [vmem:[#allocation14] sm:$0x3] %vm744_vm11, %v969_v3  ;;  %v449_v45 = vmul.f32 %v1413_v30, %v448_v7  ;;  %v458_v28 = vor.u32 1.1754944e-38, %v457_v21  ;;  %vm2304_vm2 = vcmp.eq.f32.partialorder %v440_v49, 8.507059e+37  ;;  %v443_v59 = vor.u32 1.1754944e-38, %v442_v58  ;;  %vm468_vm4 = vmor %vm466_vm9, %vm467_vm0 }
 0x25a   :  { %v1417_v23 = vpop.eup %1416  ;;  %522 = vst.msk [vmem:[#allocation9 + $0x2] sm:$0x3] %vm107_vm10, %v430_v55  ;;  %v464_v33 = vmul.f32 %v1415_v51, %v463_v13  ;;  %v473_v27 = vor.u32 1.1754944e-38, %v472_v4  ;;  %vm496_vm5 = vweird.f32 %v2275_v37  ;;  %v500_v19 = vand.u32 2147483647, %v2275_v37 }
 0x25b   :  { %v432_v34 = vmul.f32 %v1417_v23, %v2265_v20  ;;  %v2290_v18 = vpop.xlane.xlu2 %393  ;;  %v450_v22 = vadd.f32 %v1413_v30, %v449_v45  ;;  %vm437_vm1 = vweird.f32 %v1417_v23  ;;  %vm511_vm7 = vweird.f32 %v2277_v2 }
 0x25c   :  { %1422 = vrcp.f32 %v2290_v18  ;;  %v2302_v40 = vpop.eup %1418  ;;  %v465_v5 = vadd.f32 %v1415_v51, %v464_v33  ;;  %vm438_vm6 = vmor %vm436_vm14, %vm437_vm1  ;;  %vm481_vm9 = vweird.f32 %v2290_v18  ;;  %vm2351_vm12 = vcmp.eq.f32.partialorder %v500_v19, 8.507059e+37 }
 0x25d   :  { %v433_v42 = vsub.f32 1.0, %v432_v34  ;;  %v454_v3 = vsel %vm453_vm3, %v1413_v30, %v450_v22  ;;  %v492_v11 = vmul.f32 %v2302_v40, %v2275_v37  ;;  %v2312_v31 = vpop.xlane.xlu0 %947  ;;  %v502_v30 = vand.u32 2147483648, %v2275_v37 }
 0x25e   :  { %v2314_v0 = vpop.eup %1420  ;;  %v459_v24 = vsel %vm2292_vm13, %v458_v28, %v454_v3  ;;  %v469_v26 = vsel %vm468_vm4, %v1415_v51, %v465_v5  ;;  %1424 = vrcp.f32 %v2312_v31  ;;  %v485_v51 = vand.u32 2147483647, %v2290_v18  ;;  %v2339_v58 = vpop.xlane.xlu1 %941 }
 0x25f   :  { %v434_v8 = vmul.f32 %v1417_v23, %v433_v42  ;;  %v460_v1 = vmul.f32 %v2106_v54, %v459_v24  ;;  %v493_v6 = vsub.f32 1.0, %v492_v11  ;;  %v474_v39 = vsel %vm2298_vm15, %v473_v27, %v469_v26 }
 0x260   :  { %v507_v7 = vmul.f32 %v2314_v0, %v2277_v2  ;;  %v475_v20 = vmul.f32 %v2111_v57, %v474_v39  ;;  %v487_v34 = vand.u32 2147483648, %v2290_v18  ;;  %vm497_vm8 = vweird.f32 %v2302_v40 }
 0x261   :  { %v435_v21 = vadd.f32 %v1417_v23, %v434_v8  ;;  %524 = vst.msk [vmem:[#allocation9 + $0x6] sm:$0x3] %vm107_vm10, %v460_v1  ;;  %v494_v57 = vmul.f32 %v2302_v40, %v493_v6  ;;  %v517_v42 = vand.u32 2147483648, %v2277_v2  ;;  %v503_v33 = vor.u32 1.1754944e-38, %v502_v30  ;;  %vm498_vm15 = vmor %vm496_vm5, %vm497_vm8 }
 0x262   :  { %v1423_v55 = vpop.eup %1422  ;;  %525 = vst.msk [vmem:[#allocation9 + $0x8] sm:$0x3] %vm107_vm10, %v475_v20  ;;  %v508_v50 = vsub.f32 1.0, %v507_v7  ;;  %vm2360_vm14 = vcmp.eq.f32.partialorder %v485_v51, 8.507059e+37  ;;  %vm512_vm0 = vweird.f32 %v2314_v0  ;;  %v488_v3 = vor.u32 1.1754944e-38, %v487_v34 }
 0x263   :  { %v439_v4 = vsel %vm438_vm6, %v1417_v23, %v435_v21  ;;  %v477_v54 = vmul.f32 %v1423_v55, %v2290_v18  ;;  %v2337_v49 = vpop.xlane.xlu2 %944  ;;  %v515_v23 = vand.u32 2147483647, %v2277_v2  ;;  %vm482_vm13 = vweird.f32 %v1423_v55  ;;  %vm513_vm3 = vmor %vm511_vm7, %vm512_vm0 }
 0x264   :  { %v444_v13 = vsel %vm2304_vm2, %v443_v59, %v439_v4  ;;  %1426 = vrcp.f32 %v2337_v49  ;;  %v2358_v48 = vpop.eup %1424  ;;  %v509_v27 = vmul.f32 %v2314_v0, %v508_v50  ;;  %vm483_vm2 = vmor %vm481_vm9, %vm482_vm13  ;;  %v518_v30 = vor.u32 1.1754944e-38, %v517_v42 }
 0x265   :  { %v445_v45 = vmul.f32 %v2129_v44, %v444_v13  ;;  %v478_v25 = vsub.f32 1.0, %v477_v54  ;;  %v495_v44 = vadd.f32 %v2302_v40, %v494_v57  ;;  %1428 = vrcp.f32 %v2339_v58 }
 0x266   :  { %vm2370_vm1 = vcmp.eq.f32.partialorder %v515_v23, 8.507059e+37  ;;  %v510_v19 = vadd.f32 %v2314_v0, %v509_v27  ;;  %v1001_v21 = vmul.f32 %v2358_v48, %v2312_v31  ;;  %v994_v26 = vand.u32 2147483647, %v2337_v49  ;;  %v2405_v51 = vpop.xlane.xlu1 %950 }
 0x267   :  { %523 = vst.msk [vmem:[#allocation9 + $0x4] sm:$0x3] %vm107_vm10, %v445_v45  ;;  %v479_v22 = vmul.f32 %v1423_v55, %v478_v25  ;;  %v499_v5 = vsel %vm498_vm15, %v2302_v40, %v495_v44  ;;  %v1009_v54 = vand.u32 2147483647, %v2312_v31  ;;  %vm990_vm4 = vweird.f32 %v2337_v49 }
 0x268   :  { %v504_v37 = vsel %vm2351_vm12, %v503_v33, %v499_v5  ;;  %v514_v39 = vsel %vm513_vm3, %v2314_v0, %v510_v19  ;;  %v1002_v0 = vsub.f32 1.0, %v1001_v21  ;;  %v1011_v34 = vand.u32 2147483648, %v2312_v31 }
 0x269   :  { %v480_v8 = vadd.f32 %v1423_v55, %v479_v22  ;;  %v505_v6 = vmul.f32 %v2127_v35, %v504_v37  ;;  %v996_v35 = vand.u32 2147483648, %v2337_v49  ;;  %v519_v4 = vsel %vm2370_vm1, %v518_v30, %v514_v39 }
 0x26a   :  { %v1427_v24 = vpop.eup %1426  ;;  %v520_v13 = vmul.f32 %v2131_v60, %v519_v4  ;;  %vm2412_vm6 = vcmp.eq.f32.partialorder %v994_v26, 8.507059e+37  ;;  %v1003_v25 = vmul.f32 %v2358_v48, %v1002_v0  ;;  %vm1005_vm7 = vweird.f32 %v2312_v31 }
 0x26b   :  { %v484_v1 = vsel %vm483_vm2, %v1423_v55, %v480_v8  ;;  %v986_v40 = vmul.f32 %v1427_v24, %v2337_v49  ;;  %v2388_v18 = vpop.xlane.xlu2 %953  ;;  %527 = vst.msk [vmem:[#allocation9 + $0xc] sm:$0x3] %vm107_vm10, %v505_v6  ;;  %v1429_v20 = vpop.eup %1428  ;;  %vm991_vm5 = vweird.f32 %v1427_v24  ;;  %vm1006_vm8 = vweird.f32 %v2358_v48 }
 0x26c   :  { %v489_v55 = vsel %vm2360_vm14, %v488_v3, %v484_v1  ;;  %1430 = vrcp.f32 %v2388_v18  ;;  %v971_v45 = vmul.f32 %v1429_v20, %v2339_v58  ;;  %528 = vst.msk [vmem:[#allocation9 + $0xe] sm:$0x3] %vm107_vm10, %v520_v13  ;;  %v997_v57 = vor.u32 1.1754944e-38, %v996_v35  ;;  %vm992_vm12 = vmor %vm990_vm4, %vm991_vm5 }
 0x26d   :  { %v490_v2 = vmul.f32 %v2147_v12, %v489_v55  ;;  %v987_v7 = vsub.f32 1.0, %v986_v40  ;;  %1432 = vrcp.f32 %v2405_v51  ;;  %vm2422_vm9 = vcmp.eq.f32.partialorder %v1009_v54, 8.507059e+37  ;;  %vm1007_vm13 = vmor %vm1005_vm7, %vm1006_vm8 }
 0x26e   :  { %v972_v50 = vsub.f32 1.0, %v971_v45  ;;  %v1004_v22 = vadd.f32 %v2358_v48, %v1003_v25  ;;  %v1012_v44 = vor.u32 1.1754944e-38, %v1011_v34  ;;  %v979_v33 = vand.u32 2147483647, %v2339_v58 }
 0x26f   :  { %526 = vst.msk [vmem:[#allocation9 + $0xa] sm:$0x3] %vm107_vm10, %v490_v2  ;;  %v988_v12 = vmul.f32 %v1427_v24, %v987_v7  ;;  %v981_v59 = vand.u32 2147483648, %v2339_v58  ;;  %vm976_vm14 = vweird.f32 %v1429_v20  ;;  %v1039_v5 = vand.u32 2147483647, %v2388_v18 }
 0x270   :  { %1202 = dma.vmem_to_hbm [thread:$0]  %s1195_s26, 256, %s1197_s29, [#allocation10], %s1641_s20, %s1641_s20, %s1642_s21   ;;  %v973_v3 = vmul.f32 %v1429_v20, %v972_v50  ;;  %v1008_v11 = vsel %vm1007_vm13, %v2358_v48, %v1004_v22  ;;  %vm975_vm15 = vweird.f32 %v2339_v58  ;;  %v1041_v21 = vand.u32 2147483648, %v2388_v18 }
 0x271   :  { %v989_v60 = vadd.f32 %v1427_v24, %v988_v12  ;;  %v1013_v19 = vsel %vm2422_vm9, %v1012_v44, %v1008_v11  ;;  %vm977_vm0 = vmor %vm975_vm15, %vm976_vm14  ;;  %vm980_vm1 = vcmp.eq.f32.partialorder %v979_v33, 8.507059e+37  ;;  %v982_v40 = vor.u32 1.1754944e-38, %v981_v59 }
 0x272   :  { %v1431_v42 = vpop.eup %1430  ;;  %v974_v30 = vadd.f32 %v1429_v20, %v973_v3  ;;  %v1014_v1 = vmul.f32 %v2145_v29, %v1013_v19  ;;  %vm1035_vm3 = vweird.f32 %v2388_v18  ;;  %vm1040_vm5 = vcmp.eq.f32.partialorder %v1039_v5, 8.507059e+37 }
 0x273   :  { %v993_v27 = vsel %vm992_vm12, %v1427_v24, %v989_v60  ;;  %v1031_v8 = vmul.f32 %v1431_v42, %v2388_v18  ;;  %v1433_v31 = vpop.eup %1432  ;;  %vm1036_vm2 = vweird.f32 %v1431_v42  ;;  %v1042_v29 = vor.u32 1.1754944e-38, %v1041_v21 }
 0x274   :  { %v998_v49 = vsel %vm2412_vm6, %v997_v57, %v993_v27  ;;  %v978_v58 = vsel %vm977_vm0, %v1429_v20, %v974_v30  ;;  %1048 = vst.msk [vmem:[#allocation14 + $0x6] sm:$0x3] %vm744_vm11, %v1014_v1  ;;  %vm1037_vm4 = vmor %vm1035_vm3, %vm1036_vm2  ;;  %v1026_v39 = vand.u32 2147483648, %v2405_v51  ;;  %vm1021_vm6 = vweird.f32 %v1433_v31 }
 0x275   :  { %v999_v24 = vmul.f32 %v2158_v14, %v998_v49  ;;  %v1032_v37 = vsub.f32 1.0, %v1031_v8  ;;  %v1016_v14 = vmul.f32 %v1433_v31, %v2405_v51  ;;  %v983_v26 = vsel %vm980_vm1, %v982_v40, %v978_v58 }
 0x276   :  { %v984_v55 = vmul.f32 %v2143_v38, %v983_v26  ;;  %v1024_v4 = vand.u32 2147483647, %v2405_v51  ;;  %vm1020_vm7 = vweird.f32 %v2405_v51  ;;  %v1027_v38 = vor.u32 1.1754944e-38, %v1026_v39 }
 0x277   :  { %1047 = vst.msk [vmem:[#allocation14 + $0x4] sm:$0x3] %vm744_vm11, %v999_v24  ;;  %v1033_v48 = vmul.f32 %v1431_v42, %v1032_v37  ;;  %v1017_v35 = vsub.f32 1.0, %v1016_v14  ;;  %vm1022_vm8 = vmor %vm1020_vm7, %vm1021_vm6  ;;  %v1075_v25 = vcvt.f32.s32 %v2175_v17  ;;  %v1646_v60 = vmov 0.0  }
 0x278   :  { %1046 = vst.msk [vmem:[#allocation14 + $0x2] sm:$0x3] %vm744_vm11, %v984_v55  ;;  %vm1025_vm9 = vcmp.eq.f32.partialorder %v1024_v4, 8.507059e+37  ;;  %v572_v57 = vcvt.f32.s32 %v2177_v41  ;;  %v587_v27 = vcvt.f32.s32 %v2186_v53  ;;  %v617_v17 = vcvt.f32.s32 %v2188_v36 }
 0x279   :  { %v1034_v6 = vadd.f32 %v1431_v42, %v1033_v48  ;;  %v1018_v7 = vmul.f32 %v1433_v31, %v1017_v35  ;;  %v1076_v28 = vshll.u32 %v1075_v25, 16  ;;  %v602_v41 = vcvt.f32.s32 %v2190_v56 }
 0x27a   :  { %v573_v22 = vshll.u32 %v572_v57, 16  ;;  %v588_v5 = vshll.u32 %v587_v27, 16  ;;  %v618_v24 = vshll.u32 %v617_v17, 16  ;;  %v632_v1 = vcvt.f32.s32 %v2201_v15 }
 0x27b   :  { %v1038_v2 = vsel %vm1037_vm4, %v1431_v42, %v1034_v6  ;;  %v1019_v13 = vadd.f32 %v1433_v31, %v1018_v7  ;;  %v603_v36 = vshll.u32 %v602_v41, 16  ;;  %v662_v40 = vcvt.f32.s32 %v2203_v62 }
 0x27c   :  { %v1043_v54 = vsel %vm1040_vm5, %v1042_v29, %v1038_v2  ;;  %v647_v58 = vcvt.f32.s32 %v2205_v10  ;;  %v633_v6 = vshll.u32 %v632_v1, 16  ;;  %v1105_v57 = vcvt.f32.s32 %v2229_v61 }
 0x27d   :  { %v1044_v20 = vmul.f32 %v2164_v9, %v1043_v54  ;;  %v1023_v18 = vsel %vm1022_vm8, %v1433_v31, %v1019_v13  ;;  %v557_v9 = vcvt.f32.s32 %v2169_v32  ;;  %v663_v35 = vshll.u32 %v662_v40, 16 }
 0x27e   :  { %v1028_v0 = vsel %vm1025_vm9, %v1027_v38, %v1023_v18  ;;  %v648_v10 = vshll.u32 %v647_v58, 16  ;;  %v1120_v54 = vcvt.f32.s32 %v2215_v52  ;;  %v1090_v38 = vcvt.f32.s32 %v2217_v63 }
 0x27f   :  { %1050 = vst.msk [vmem:[#allocation14 + $0xa] sm:$0x3] %vm744_vm11, %v1044_v20  ;;  %v1029_v34 = vmul.f32 %v2156_v46, %v1028_v0  ;;  %v558_v12 = vshll.u32 %v557_v9, 16  ;;  %v1150_v17 = vcvt.f32.s32 %v2237_v43 }
 0x280   :  { %v1091_v63 = vshll.u32 %v1090_v38, 16 }
 0x281   :  { %1049 = vst.msk [vmem:[#allocation14 + $0x8] sm:$0x3] %vm744_vm11, %v1029_v34  ;;  %v1121_v34 = vshll.u32 %v1120_v54, 16  ;;  %v1151_v41 = vshll.u32 %v1150_v17, 16 }
 0x282   :  { %1241 = dma.vmem_to_hbm [thread:$0]  %s1234_s30, 192, %s1236_s11, [#allocation13], %s1641_s20, %s1641_s20, %s1642_s21  }
 0x28b   :  { %v555_v51 = vpop.xlane.xlu0 %554 }
 0x28c   :  { %v556_v23 = vcvt.f32.s32 %v555_v51 }
 0x28e   :  { %v559_v45 = vadd.s32 %v558_v12, %v556_v23 }
 0x290   :  { %vm665_vm12 = vcmp.eq.s32.totalorder %v1708_v16, %v559_v45 }
 0x291   :  { %v1285_v46 = vsel %vm665_vm12, 1.0, %v1646_v60 }
 0x292   :  { %689 = vst.msk [vmem:[#allocation11] sm:$0x3] %vm107_vm10, %v1285_v46  ;;  %v1135_v46 = vcvt.f32.s32 %v2225_v47 }
 0x293   :  { %v1073_v32 = vpop.xlane.xlu0 %1072  ;;  %v570_v42 = vpop.xlane.xlu2 %569 }
 0x294   :  { %v1074_v50 = vcvt.f32.s32 %v1073_v32  ;;  %v571_v44 = vcvt.f32.s32 %v570_v42 }
 0x296   :  { %v1077_v33 = vadd.s32 %v1076_v28, %v1074_v50  ;;  %v574_v59 = vadd.s32 %v573_v22, %v571_v44  ;;  %v1136_v50 = vshll.u32 %v1135_v46, 16  ;;  %v1106_v44 = vshll.u32 %v1105_v57, 16 }
 0x298   :  { %vm1153_vm13 = vcmp.eq.s32.totalorder %v1708_v16, %v1077_v33  ;;  %vm666_vm14 = vcmp.eq.s32.totalorder %v1708_v16, %v574_v59 }
 0x299   :  { %v1293_v8 = vsel %vm1153_vm13, 1.0, %v1646_v60  ;;  %v1286_v3 = vsel %vm666_vm14, 1.0, %v1646_v60 }
 0x29a   :  { %1171 = vst.msk [vmem:[#allocation15] sm:$0x3] %vm744_vm11, %v1293_v8 }
 0x29b   :  { %690 = vst.msk [vmem:[#allocation11 + $0x2] sm:$0x3] %vm107_vm10, %v1286_v3  ;;  %v585_v49 = vpop.xlane.xlu0 %584  ;;  %v615_v53 = vpop.xlane.xlu2 %614 }
 0x29c   :  { %v586_v11 = vcvt.f32.s32 %v585_v49  ;;  %v616_v37 = vcvt.f32.s32 %v615_v53  ;;  %v600_v19 = vpop.xlane.xlu1 %599 }
 0x29d   :  { %v601_v31 = vcvt.f32.s32 %v600_v19 }
 0x29e   :  { %v589_v30 = vadd.s32 %v588_v5, %v586_v11  ;;  %v619_v21 = vadd.s32 %v618_v24, %v616_v37 }
 0x29f   :  { %v604_v56 = vadd.s32 %v603_v36, %v601_v31 }
 0x2a0   :  { %vm667_vm15 = vcmp.eq.s32.totalorder %v1708_v16, %v589_v30  ;;  %vm669_vm0 = vcmp.eq.s32.totalorder %v1708_v16, %v619_v21 }
 0x2a1   :  { %v1287_v48 = vsel %vm667_vm15, 1.0, %v1646_v60  ;;  %v1289_v14 = vsel %vm669_vm0, 1.0, %v1646_v60  ;;  %vm668_vm1 = vcmp.eq.s32.totalorder %v1708_v16, %v604_v56 }
 0x2a2   :  { %691 = vst.msk [vmem:[#allocation11 + $0x4] sm:$0x3] %vm107_vm10, %v1287_v48  ;;  %v1288_v15 = vsel %vm668_vm1, 1.0, %v1646_v60 }
 0x2a3   :  { %693 = vst.msk [vmem:[#allocation11 + $0x8] sm:$0x3] %vm107_vm10, %v1289_v14  ;;  %v630_v26 = vpop.xlane.xlu0 %629  ;;  %v660_v55 = vpop.xlane.xlu2 %659 }
 0x2a4   :  { %692 = vst.msk [vmem:[#allocation11 + $0x6] sm:$0x3] %vm107_vm10, %v1288_v15  ;;  %v631_v62 = vcvt.f32.s32 %v630_v26  ;;  %v661_v29 = vcvt.f32.s32 %v660_v55  ;;  %v645_v39 = vpop.xlane.xlu1 %644 }
 0x2a5   :  { %v646_v7 = vcvt.f32.s32 %v645_v39 }
 0x2a6   :  { %v634_v2 = vadd.s32 %v633_v6, %v631_v62  ;;  %v664_v4 = vadd.s32 %v663_v35, %v661_v29 }
 0x2a7   :  { %v649_v20 = vadd.s32 %v648_v10, %v646_v7 }
 0x2a8   :  { %vm670_vm2 = vcmp.eq.s32.totalorder %v1708_v16, %v634_v2  ;;  %vm672_vm3 = vcmp.eq.s32.totalorder %v1708_v16, %v664_v4 }
 0x2a9   :  { %v1290_v13 = vsel %vm670_vm2, 1.0, %v1646_v60  ;;  %v1292_v18 = vsel %vm672_vm3, 1.0, %v1646_v60  ;;  %vm671_vm4 = vcmp.eq.s32.totalorder %v1708_v16, %v649_v20 }
 0x2aa   :  { %694 = vst.msk [vmem:[#allocation11 + $0xa] sm:$0x3] %vm107_vm10, %v1290_v13  ;;  %v1291_v52 = vsel %vm671_vm4, 1.0, %v1646_v60 }
 0x2ab   :  { %696 = vst.msk [vmem:[#allocation11 + $0xe] sm:$0x3] %vm107_vm10, %v1292_v18  ;;  %v1118_v0 = vpop.xlane.xlu0 %1117 }
 0x2ac   :  { %695 = vst.msk [vmem:[#allocation11 + $0xc] sm:$0x3] %vm107_vm10, %v1291_v52  ;;  %v1119_v9 = vcvt.f32.s32 %v1118_v0  ;;  %v1088_v51 = vpop.xlane.xlu1 %1087 }
 0x2ad   :  { %1215 = dma.vmem_to_hbm [thread:$0]  %s1208_s12, 256, %s1210_s1, [#allocation10], %s1641_s20, %s1641_s20, %s1642_s21   ;;  %v1089_v23 = vcvt.f32.s32 %v1088_v51 }
 0x2ae   :  { %v1122_v12 = vadd.s32 %v1121_v34, %v1119_v9 }
 0x2af   :  { %v1092_v45 = vadd.s32 %v1091_v63, %v1089_v23 }
 0x2b0   :  { %vm1156_vm5 = vcmp.eq.s32.totalorder %v1708_v16, %v1122_v12 }
 0x2b1   :  { %v1296_v25 = vsel %vm1156_vm5, 1.0, %v1646_v60  ;;  %vm1154_vm10 = vcmp.eq.s32.totalorder %v1708_v16, %v1092_v45 }
 0x2b2   :  { %1174 = vst.msk [vmem:[#allocation15 + $0x6] sm:$0x3] %vm744_vm11, %v1296_v25  ;;  %v1294_v32 = vsel %vm1154_vm10, 1.0, %v1646_v60 }
 0x2b3   :  { %1172 = vst.msk [vmem:[#allocation15 + $0x2] sm:$0x3] %vm744_vm11, %v1294_v32  ;;  %v1103_v42 = vpop.xlane.xlu2 %1102 }
 0x2b4   :  { %v1133_v28 = vpop.xlane.xlu1 %1132  ;;  %v1104_v33 = vcvt.f32.s32 %v1103_v42 }
 0x2b5   :  { %v1134_v22 = vcvt.f32.s32 %v1133_v28 }
 0x2b6   :  { %v1107_v27 = vadd.s32 %v1106_v44, %v1104_v33 }
 0x2b7   :  { %v1137_v59 = vadd.s32 %v1136_v50, %v1134_v22 }
 0x2b8   :  { %vm1155_vm7 = vcmp.eq.s32.totalorder %v1708_v16, %v1107_v27 }
 0x2b9   :  { %vm1157_vm6 = vcmp.eq.s32.totalorder %v1708_v16, %v1137_v59  ;;  %v1295_v61 = vsel %vm1155_vm7, 1.0, %v1646_v60 }
 0x2ba   :  { %v1297_v47 = vsel %vm1157_vm6, 1.0, %v1646_v60  ;;  %1173 = vst.msk [vmem:[#allocation15 + $0x4] sm:$0x3] %vm744_vm11, %v1295_v61 }
 0x2bb   :  { %1175 = vst.msk [vmem:[#allocation15 + $0x8] sm:$0x3] %vm744_vm11, %v1297_v47 }
 0x2c1   :  { %v1148_v8 = vpop.xlane.xlu2 %1147 }
 0x2c2   :  { %v1149_v3 = vcvt.f32.s32 %v1148_v8 }
 0x2c4   :  { %v1152_v49 = vadd.s32 %v1151_v41, %v1149_v3 }
 0x2c6   :  { %vm1158_vm8 = vcmp.eq.s32.totalorder %v1708_v16, %v1152_v49 }
 0x2c7   :  { %v1298_v5 = vsel %vm1158_vm8, 1.0, %v1646_v60 }
 0x2c8   :  { %1176 = vst.msk [vmem:[#allocation15 + $0xa] sm:$0x3] %vm744_vm11, %v1298_v5 }
 0x2c9   :  { %1254 = dma.vmem_to_hbm [thread:$0]  %s1247_s2, 192, %s1249_s16, [#allocation16], %s1641_s20, %s1641_s20, %s1642_s21  }
 0x2ca   :  { %1630 = dma.done.wait [#allocation5], 256  }
 0x2cb   :  { %1631 = vsyncadd [#allocation5], 4294967040 }
 0x2cc   :  { %1632 = dma.done.wait [#allocation10], 512  }
 0x2cd   :  { %1633 = vsyncadd [#allocation10], 4294966784 }
 0x2ce   :  { %1634 = dma.done.wait [#allocation13], 384  }
 0x2cf   :  { %1635 = vsyncadd [#allocation13], 4294966912 }
 0x2d0   :  { %1636 = dma.done.wait [#allocation16], 192  }
 0x2d1   :  { %1637 = vsyncadd [#allocation16], 4294967104 }
 0x2d2   :  { %1279 = vsyncpa [#allocation4], 1 }
 0x2d3   :  { %1280 = vsyncpa [#allocation7], 1 }
 0x2d4   :  { %1281 = vsyncpa [#allocation5], 1 }
 0x2d5   :  { %1282 = vsyncpa [#allocation10], 1 }
 0x2d6   :  { %1283 = vsyncpa [#allocation13], 1 }
 0x2d7   :  { %1284 = vsyncpa [#allocation16], 1 }

</bundles_post_ra>
